<compile_context>
chip_gen: v7x
topology: tpu7x:2x2x1
jax: 0.10.0
libtpu: 0.0.40
codegen_flags: <defaults>
</compile_context>

<pallas_src>
import jax
import jax.numpy as jnp
from jax import lax
from jax.experimental import pallas as pl
from jax.experimental.pallas import tpu as pltpu


# ---------------------------------------------------------------------------
# Runtime tuning knobs (set once, eagerly, before any jit tracing)
# ---------------------------------------------------------------------------
_PIPELINE_MODE_OK = False   # is pipeline_mode=pl.Buffered(...) usable here?
_NUM_TC = 1                 # TensorCores a "parallel" 1-D grid can shard over


def _probe_pipeline_mode():
    """Verify Buffered(1) on an invariant operand and Buffered(3) on a
    streamed operand compile, run and produce correct results."""
    try:
        def k(x_ref, w_ref, o_ref):
            o_ref[...] = x_ref[...] + w_ref[...]

        w = jnp.full((8, 128), 2.0, jnp.float32)

        out1 = pl.pallas_call(
            k,
            out_shape=jax.ShapeDtypeStruct((16, 128), jnp.float32),
            grid=(2,),
            in_specs=[pl.BlockSpec((8, 128), lambda i: (i, 0)),
                      pl.BlockSpec((8, 128), lambda i: (0, 0),
                                   pipeline_mode=pl.Buffered(1))],
            out_specs=pl.BlockSpec((8, 128), lambda i: (i, 0)),
        )(jnp.ones((16, 128), jnp.float32), w)

        out2 = pl.pallas_call(
            k,
            out_shape=jax.ShapeDtypeStruct((32, 128), jnp.float32),
            grid=(4,),
            in_specs=[pl.BlockSpec((8, 128), lambda i: (i, 0),
                                   pipeline_mode=pl.Buffered(3)),
                      pl.BlockSpec((8, 128), lambda i: (0, 0),
                                   pipeline_mode=pl.Buffered(1))],
            out_specs=pl.BlockSpec((8, 128), lambda i: (i, 0)),
        )(jnp.ones((32, 128), jnp.float32), w)

        jax.block_until_ready((out1, out2))
        return bool(jnp.allclose(out1, 3.0)) and bool(jnp.allclose(out2, 3.0))
    except Exception:
        return False


def _detect_num_tensorcores():
    try:
        dev = jax.devices()[0]
        kind = str(getattr(dev, "device_kind", "")).lower()
        if "v7" in kind:
            return 2
        ncores = getattr(dev, "num_cores", None)
        if isinstance(ncores, int) and 1 <= ncores <= 8:
            return ncores
    except Exception:
        pass
    return 1


def _init_tuning():
    global _PIPELINE_MODE_OK, _NUM_TC
    _PIPELINE_MODE_OK = _probe_pipeline_mode()
    _NUM_TC = _detect_num_tensorcores()


# ---------------------------------------------------------------------------
# Pallas kernels
# ---------------------------------------------------------------------------
def _conv_kernel(a_ref, w_ref, bias_ref, o_ref):
    # relu(bn(conv(x))): BN scale pre-folded into w, bias = folded effective.
    acc = jnp.dot(a_ref[...], w_ref[...], preferred_element_type=jnp.float32)
    o_ref[...] = jnp.maximum(acc + bias_ref[...], 0.0).astype(o_ref.dtype)


def _conv_res_kernel(a_ref, w_ref, bias_ref, res_ref, o_ref):
    # relu(bn(conv(x)) + x): residual added after the folded BN affine,
    # before the ReLU (matches the PyTorch Conv block).
    acc = jnp.dot(a_ref[...], w_ref[...], preferred_element_type=jnp.float32)
    acc = acc + bias_ref[...] + res_ref[...].astype(jnp.float32)
    o_ref[...] = jnp.maximum(acc, 0.0).astype(o_ref.dtype)


def _tail_kernel(a_ref, w1_ref, b1_ref, w2_ref, b2_ref, o_ref):
    # Fused encoder tail: (kxk conv as GEMM) -> ReLU -> (1x1 conv as GEMM)
    # -> ReLU -> row-wise L2 normalize (== F.normalize(dim=1), eps=1e-12).
    h = jnp.dot(a_ref[...], w1_ref[...], preferred_element_type=jnp.float32)
    h = jnp.maximum(h + b1_ref[...], 0.0).astype(jnp.bfloat16)
    v = jnp.dot(h, w2_ref[...], preferred_element_type=jnp.float32)
    v = jnp.maximum(v + b2_ref[...], 0.0)
    ss = jnp.sum(v * v, axis=-1, keepdims=True)
    o_ref[...] = (v / jnp.maximum(jnp.sqrt(ss), 1e-12)).astype(o_ref.dtype)


# ---------------------------------------------------------------------------
# pallas_call wrappers
# ---------------------------------------------------------------------------
def _round_up(x, m):
    return ((x + m - 1) // m) * m


def _spec(shape, index_map, buffer_count=None):
    if buffer_count is not None and _PIPELINE_MODE_OK:
        return pl.BlockSpec(shape, index_map,
                            pipeline_mode=pl.Buffered(buffer_count))
    return pl.BlockSpec(shape, index_map)


def _choose_tm(M, Kp):
    """M tile: large tiles for the overhead/DMA-bound small-K layers,
    single full tile (None) for mid/small M on single-TensorCore chips."""
    if M <= 128 or (M <= 1024 and _NUM_TC < 2):
        return None
    if M <= 256:
        return 128                       # give the 2nd TensorCore a block (v7x)
    if M <= 1024:
        return 256                       # only reached when _NUM_TC >= 2
    if Kp <= 1152:
        return 1024 if M >= 4096 else 512
    return 256


def fused_conv_matmul(patches, w_kc, bias, residual, n_out, out_dtype):
    """(M, K) @ (Kp, Np) on the MXU with fused bias/residual/ReLU epilogue.
    bf16 operands, f32 accumulation; full K resident per call (1-D M grid)."""
    M, K = patches.shape
    Kp, Np = w_kc.shape

    a = patches.astype(jnp.bfloat16)
    if K < Kp:
        a = jnp.pad(a, ((0, 0), (0, Kp - K)))

    tm = _choose_tm(M, Kp)
    Mp = _round_up(M, 16) if tm is None else _round_up(M, tm)
    if tm is None:
        tm = Mp
    if Mp > M:
        a = jnp.pad(a, ((0, Mp - M), (0, 0)))
    steps = Mp // tm

    inv_buf = 1 if steps >= 2 else None      # single-buffer invariant operands
    patch_buf = 3 if steps >= 4 else None    # deeper pipeline on big-M layers

    in_specs = [_spec((tm, Kp), lambda i: (i, 0), patch_buf),   # patches tile
                _spec((Kp, Np), lambda i: (0, 0), inv_buf),     # weight (resident)
                _spec((1, Np), lambda i: (0, 0), inv_buf)]      # effective bias
    args = [a, w_kc, bias]

    if residual is not None:
        res = residual.astype(jnp.bfloat16)
        rM, rN = res.shape
        if Mp > rM or Np > rN:
            res = jnp.pad(res, ((0, Mp - rM), (0, Np - rN)))
        in_specs.append(pl.BlockSpec((tm, Np), lambda i: (i, 0)))
        args.append(res)
        kernel = _conv_res_kernel
    else:
        kernel = _conv_kernel

    out = pl.pallas_call(
        kernel,
        out_shape=jax.ShapeDtypeStruct((Mp, Np), out_dtype),
        grid=(steps,),
        in_specs=in_specs,
        out_specs=pl.BlockSpec((tm, Np), lambda i: (i, 0)),
        compiler_params=pltpu.CompilerParams(
            dimension_semantics=("parallel",),
            vmem_limit_bytes=32 * 1024 * 1024),
    )(*args)
    if Mp != M or Np != n_out:
        # TODO(synk): keeping activations lane-padded to 128 between layers
        # would remove this slice (and the next layer's re-pad) for the
        # 32/64-channel layers.
        out = out[:M, :n_out]
    return out


def fused_tail(patches, w1, b1, w2, b2, out_dtype=jnp.float32):
    """Two back-to-back GEMMs (conv -> 1x1 conv) + ReLUs + L2 normalize in
    one kernel.  M is tiny (B*T), everything is resident in VMEM: one fewer
    launch and no HBM round trip of the 512-wide intermediate."""
    M, K = patches.shape
    K1p, N1 = w1.shape
    N2 = w2.shape[1]

    a = patches.astype(jnp.bfloat16)
    if K < K1p:
        a = jnp.pad(a, ((0, 0), (0, K1p - K)))
    Mp = _round_up(M, 16)
    if Mp > M:
        a = jnp.pad(a, ((0, Mp - M), (0, 0)))

    out = pl.pallas_call(
        _tail_kernel,
        out_shape=jax.ShapeDtypeStruct((Mp, N2), out_dtype),
        grid=(1,),
        in_specs=[pl.BlockSpec((Mp, K1p), lambda i: (0, 0)),
                  pl.BlockSpec((K1p, N1), lambda i: (0, 0)),
                  pl.BlockSpec((1, N1), lambda i: (0, 0)),
                  pl.BlockSpec((N1, N2), lambda i: (0, 0)),
                  pl.BlockSpec((1, N2), lambda i: (0, 0))],
        out_specs=pl.BlockSpec((Mp, N2), lambda i: (0, 0)),
        compiler_params=pltpu.CompilerParams(
            dimension_semantics=("arbitrary",),
            vmem_limit_bytes=32 * 1024 * 1024),
    )(a, w1, b1, w2, b2)
    # TODO(synk): cross-call weight prefetch (P10) could also hide this
    # single-grid-step call's exposed weight DMA behind earlier layers.
    return out[:M] if Mp != M else out


# ---------------------------------------------------------------------------
# Patch extraction (channels-last) -- one XLA op per layer
# ---------------------------------------------------------------------------
def _extract_patches_cl(x, ksize, stride, padding):
    """x: (B, D, H, W, C) -> (B*Do*Ho*Wo, K) in the patches op's native
    feature order (weights are permuted at prep time to match it)."""
    kd, kh, kw = ksize
    B, D, H, W, C = x.shape
    if (kd, kh, kw) == (1, 1, 1) and tuple(stride) == (1, 1, 1) \
            and tuple(padding) == (0, 0, 0):
        return x.reshape(B * D * H * W, C), (D, H, W)
    pd, ph, pw = padding
    p = lax.conv_general_dilated_patches(
        x, filter_shape=(kd, kh, kw), window_strides=tuple(stride),
        padding=((pd, pd), (ph, ph), (pw, pw)),
        dimension_numbers=("NDHWC", "DHWIO", "NDHWC"))
    # TODO(synk): moving the tap accumulation fully inside the Pallas kernel
    # (per-tap pl.ds offsets) would remove this K-amplified HBM tensor too.
    B2, Do, Ho, Wo, K = p.shape
    return p.reshape(B2 * Do * Ho * Wo, K), (Do, Ho, Wo)


_PERM_CACHE = {}


def _patch_perm(cin, ksize):
    """Permutation: patches-op feature index -> canonical (tap-major,
    channel-minor) row index, derived by probing the op itself so the
    weight layout always matches its ordering exactly."""
    key = (int(cin), tuple(int(k) for k in ksize))
    if key not in _PERM_CACHE:
        kd, kh, kw = key[1]
        K = cin * kd * kh * kw
        if kd * kh * kw == 1:
            perm = jnp.arange(K, dtype=jnp.int32)
        else:
            can = jnp.arange(K, dtype=jnp.float32).reshape(1, kd, kh, kw, cin)
            p = lax.conv_general_dilated_patches(
                can, filter_shape=(kd, kh, kw), window_strides=(1, 1, 1),
                padding="VALID",
                dimension_numbers=("NDHWC", "DHWIO", "NDHWC"))
            perm = jnp.round(p.reshape(K)).astype(jnp.int32)
        _PERM_CACHE[key] = perm
    return _PERM_CACHE[key]


def conv_block_cl(x, prep, cfg, out_dtype=jnp.bfloat16):
    cin, cout, ks, st, pd, res = cfg
    w_rows, bias = prep
    B = x.shape[0]
    patches, (Do, Ho, Wo) = _extract_patches_cl(x, ks, st, pd)
    residual = x.reshape(-1, x.shape[-1]) if res else None   # zero-copy view
    out = fused_conv_matmul(patches, w_rows, bias, residual, cout, out_dtype)
    return out.reshape(B, Do, Ho, Wo, cout)


# ---------------------------------------------------------------------------
# Model definition (configs mirror the PyTorch __init__)
# ---------------------------------------------------------------------------
FACE_CFG = [
    (3,   32,  (5, 5, 5), (1, 1, 2), (0, 2, 2), False),
    (32,  64,  (1, 3, 3), (1, 2, 2), (0, 1, 1), False),
    (64,  64,  (1, 3, 3), (1, 1, 1), (0, 1, 1), True),
    (64,  64,  (1, 3, 3), (1, 1, 1), (0, 1, 1), True),
    (64,  128, (1, 3, 3), (1, 2, 2), (0, 1, 1), False),
    (128, 128, (1, 3, 3), (1, 1, 1), (0, 1, 1), True),
    (128, 128, (1, 3, 3), (1, 1, 1), (0, 1, 1), True),
    (128, 256, (1, 3, 3), (1, 2, 2), (0, 1, 1), False),
    (256, 256, (1, 3, 3), (1, 1, 1), (0, 1, 1), True),
    (256, 256, (1, 3, 3), (1, 1, 1), (0, 1, 1), True),
    (256, 512, (1, 3, 3), (1, 2, 2), (0, 1, 1), False),
    (512, 512, (1, 3, 3), (1, 1, 1), (0, 0, 0), False),
    (512, 512, (1, 1, 1), (1, 1, 1), (0, 0, 0), False),
]

_AUDIO_CFG_2D = [
    (1,   32,  (3, 3), (2, 1), (1, 1), False),
    (32,  32,  (3, 3), (1, 1), (1, 1), True),
    (32,  32,  (3, 3), (1, 1), (1, 1), True),
    (32,  64,  (3, 3), (2, 2), (1, 1), False),
    (64,  64,  (3, 3), (1, 1), (1, 1), True),
    (64,  64,  (3, 3), (1, 1), (1, 1), True),
    (64,  128, (3, 3), (2, 1), (1, 1), False),
    (128, 128, (3, 3), (1, 1), (1, 1), True),
    (128, 128, (3, 3), (1, 1), (1, 1), True),
    (128, 256, (3, 3), (2, 2), (1, 1), False),
    (256, 256, (3, 3), (1, 1), (1, 1), True),
    (256, 256, (3, 3), (1, 1), (1, 1), True),
    (256, 512, (5, 5), (1, 1), (0, 0), False),
    (512, 512, (1, 1), (1, 1), (0, 0), False),
]
# Lift the 2D audio convs to 3D with a singleton depth axis.
AUDIO_CFG = [(ci, co, (1,) + ks, (1,) + st, (0,) + pd, r)
             for (ci, co, ks, st, pd, r) in _AUDIO_CFG_2D]


def init_conv_params(key, cin, cout, ksize):
    """Deterministic synthetic params; eval-mode BatchNorm folded into
    (scale, bias_eff)."""
    kd, kh, kw = ksize
    kw_, kb, kg, kbe, km, kv = jax.random.split(key, 6)
    fan_in = cin * kd * kh * kw
    w = jax.random.normal(kw_, (cout, cin, kd, kh, kw), jnp.float32) \
        * jnp.sqrt(2.0 / fan_in)
    b = 0.01 * jax.random.normal(kb, (cout,), jnp.float32)
    gamma = 1.0 + 0.05 * jax.random.normal(kg, (cout,), jnp.float32)
    beta = 0.05 * jax.random.normal(kbe, (cout,), jnp.float32)
    mean = 0.05 * jax.random.normal(km, (cout,), jnp.float32)
    var = 1.0 + 0.05 * jnp.abs(jax.random.normal(kv, (cout,), jnp.float32))
    inv_std = 1.0 / jnp.sqrt(var + 1e-5)
    scale = gamma * inv_std
    bias_eff = (b - mean) * scale + beta
    return (w, scale, bias_eff)


def init_encoder_params(key, cfgs):
    keys = jax.random.split(key, len(cfgs))
    return [init_conv_params(k, ci, co, ks)
            for k, (ci, co, ks, st, pd, r) in zip(keys, cfgs)]


def prepare_conv_params(raw, cfg):
    """One-time prep: (Kp, Np) bf16 weight rows (patches-op ordering, eval-BN
    scale folded in) and (1, Np) f32 effective bias."""
    w, scale, bias_eff = raw
    cin, cout, ks, _, _, _ = cfg
    kd, kh, kw = ks
    K = cin * kd * kh * kw
    Kp = _round_up(K, 128)
    Np = _round_up(cout, 128)
    w_can = jnp.transpose(w, (2, 3, 4, 1, 0)).reshape(K, cout)   # canonical rows
    w_rows = jnp.take(w_can, _patch_perm(cin, ks), axis=0)       # match patches op
    w_rows = w_rows * scale[None, :]                             # fold BN scale
    w_rows = jnp.pad(w_rows, ((0, Kp - K), (0, Np - cout))).astype(jnp.bfloat16)
    b = jnp.pad(bias_eff.reshape(1, cout).astype(jnp.float32),
                ((0, 0), (0, Np - cout)))
    return (w_rows, b)


def prepare_encoder_params(params, cfgs):
    n = len(cfgs)
    layer_preps = [prepare_conv_params(p, c)
                   for p, c in zip(params[:n - 2], cfgs[:n - 2])]
    w1, b1 = prepare_conv_params(params[n - 2], cfgs[n - 2])   # kxk -> 512
    w2, b2 = prepare_conv_params(params[n - 1], cfgs[n - 1])   # 1x1, 512 -> 512
    return (layer_preps, (w1, b1, w2, b2))


def _encoder_forward(x, enc_prep, cfgs):
    layer_preps, (w1, b1, w2, b2) = enc_prep
    n = len(cfgs)
    for prep, cfg in zip(layer_preps, cfgs[:n - 2]):
        x = conv_block_cl(x, prep, cfg)
    # Fused tail: penultimate conv + final 1x1 conv + ReLUs + L2 normalize.
    _, _, ks1, st1, pd1, _ = cfgs[n - 2]
    B = x.shape[0]
    patches, (Do, Ho, Wo) = _extract_patches_cl(x, ks1, st1, pd1)
    emb = fused_tail(patches, w1, b1, w2, b2)            # (B*Do*Ho*Wo, 512) f32
    return emb.reshape(B, Do, Ho, Wo, emb.shape[-1])


def syncnet_forward(audio_sequences, face_sequences, face_prep, audio_prep):
    """audio: (B, 1, H_mel, W_mel) NCHW;  face: (B, 3, T, H, W) NCDHW.
    Returns (audio_embedding (B,512,Wa'), face_embedding (B,512,T'))."""
    face_x = jnp.transpose(face_sequences, (0, 2, 3, 4, 1)).astype(jnp.bfloat16)
    audio_x = jnp.transpose(audio_sequences[:, :, None, :, :],
                            (0, 2, 3, 4, 1)).astype(jnp.bfloat16)

    face_out = _encoder_forward(face_x, face_prep, FACE_CFG)      # (B,T',1,1,512)
    audio_out = _encoder_forward(audio_x, audio_prep, AUDIO_CFG)  # (B,1,1,W',512)

    face_emb = jnp.transpose(face_out[:, :, 0, 0, :], (0, 2, 1))    # (B,512,T')
    audio_emb = jnp.transpose(audio_out[:, 0, 0, :, :], (0, 2, 1))  # (B,512,W')
    return audio_emb, face_emb


# ---------------------------------------------------------------------------
if __name__ == "__main__":
    _init_tuning()

    key = jax.random.PRNGKey(0)
    k_face_p, k_audio_p, k_face_x, k_audio_x = jax.random.split(key, 4)

    face_params = init_encoder_params(k_face_p, FACE_CFG)
    audio_params = init_encoder_params(k_audio_p, AUDIO_CFG)
    # One-time param prep (permute / fold BN / pad / cast) outside the jit.
    face_prep = prepare_encoder_params(face_params, FACE_CFG)
    audio_prep = prepare_encoder_params(audio_params, AUDIO_CFG)

    # Small-but-consistent shapes: face (B,3,T=6,48,96) -> (B,512,2);
    # audio mel (B,1,80,24) -> (B,512,2).
    B = 2
    face_x = jax.random.normal(k_face_x, (B, 3, 6, 48, 96), jnp.float32)
    audio_x = jax.random.normal(k_audio_x, (B, 1, 80, 24), jnp.float32)

    # One-layer numerical self-check (validates the patches/weight ordering
    # and the BN fold) against an XLA conv reference, bf16-tolerant.
    face_layer_preps, _ = face_prep
    x_cl = jnp.transpose(face_x, (0, 2, 3, 4, 1)).astype(jnp.bfloat16)
    mine = conv_block_cl(x_cl, face_layer_preps[0], FACE_CFG[0]).astype(jnp.float32)
    w0, s0, b0 = face_params[0]
    _, _, ks0, st0, pd0, _ = FACE_CFG[0]
    ref = lax.conv_general_dilated(
        x_cl.astype(jnp.float32), jnp.transpose(w0, (2, 3, 4, 1, 0)),
        window_strides=st0, padding=[(p, p) for p in pd0],
        dimension_numbers=("NDHWC", "DHWIO", "NDHWC"),
        precision=lax.Precision.HIGHEST)
    ref = jnp.maximum(ref * s0 + b0, 0.0)
    err = float(jnp.max(jnp.abs(mine - ref)))
    tol = 0.1 * (float(jnp.max(jnp.abs(ref))) + 1.0)
    assert err <= tol, f"conv block self-check failed: err={err:.4f} tol={tol:.4f}"

    fwd = jax.jit(syncnet_forward)
    audio_emb, face_emb = fwd(audio_x, face_x, face_prep, audio_prep)
    jax.block_until_ready((audio_emb, face_emb))

    assert audio_emb.shape == (B, 512, 2), audio_emb.shape
    assert face_emb.shape == (B, 512, 2), face_emb.shape
    assert bool(jnp.all(jnp.isfinite(audio_emb))) and bool(jnp.all(jnp.isfinite(face_emb)))
    print("KERNEL_OK")
</pallas_src>

<mosaic_0001>
module attributes {stable_mosaic.version = 11 : i64} {
  func.func @k(%arg0: i32, %arg1: memref<8x128xf32, #tpu.memory_space<vmem>>, %arg2: memref<8x128xf32, #tpu.memory_space<vmem>>, %arg3: memref<8x128xf32, #tpu.memory_space<vmem>>) attributes {dimension_semantics = [#tpu.dimension_semantics<arbitrary>], iteration_bounds = array<i64: 2>, scalar_prefetch = 0 : i64, scratch_operands = 0 : i64, tpu.core_type = #tpu.core_type<tc>, window_params = [{transform_indices = @transform_0, window_bounds = array<i64: 8, 128>}, {pipeline_mode = #tpu.pipeline_mode<synchronous>, transform_indices = @transform_1, window_bounds = array<i64: 8, 128>}, {transform_indices = @transform_2, window_bounds = array<i64: 8, 128>}]} {
    %c0 = arith.constant 0 : index
    %c0_0 = arith.constant 0 : index
    %0 = vector.load %arg1[%c0, %c0_0] : memref<8x128xf32, #tpu.memory_space<vmem>>, vector<8x128xf32>
    %c0_1 = arith.constant 0 : index
    %c0_2 = arith.constant 0 : index
    %1 = vector.load %arg2[%c0_1, %c0_2] : memref<8x128xf32, #tpu.memory_space<vmem>>, vector<8x128xf32>
    %2 = arith.addf %0, %1 : vector<8x128xf32>
    %c0_3 = arith.constant 0 : index
    %c0_4 = arith.constant 0 : index
    %3 = vector.load %arg3[%c0_3, %c0_4] : memref<8x128xf32, #tpu.memory_space<vmem>>, vector<8x128xf32>
    tpu.vector_store %arg3[%c0_3, %c0_4], %2 {strides = array<i32>} : memref<8x128xf32, #tpu.memory_space<vmem>>, vector<8x128xf32>,
    return
  }
  func.func @transform_0(%arg0: i32) -> (i32, i32) {
    %c0_i32 = arith.constant 0 : i32
    %c0_i32_0 = arith.constant 0 : i32
    return %arg0, %c0_i32 : i32, i32
  }
  func.func @transform_1(%arg0: i32) -> (i32, i32) {
    %c0_i32 = arith.constant 0 : i32
    %c0_i32_0 = arith.constant 0 : i32
    %c0_i32_1 = arith.constant 0 : i32
    return %c0_i32, %c0_i32_0 : i32, i32
  }
  func.func @transform_2(%arg0: i32) -> (i32, i32) {
    %c0_i32 = arith.constant 0 : i32
    %c0_i32_0 = arith.constant 0 : i32
    return %arg0, %c0_i32 : i32, i32
  }
}

module attributes {stable_mosaic.version = 11 : i64} {
  func.func @_conv_kernel(%arg0: i32, %arg1: memref<1024x384xbf16, #tpu.memory_space<vmem>>, %arg2: memref<384x128xbf16, #tpu.memory_space<vmem>>, %arg3: memref<1x128xf32, #tpu.memory_space<vmem>>, %arg4: memref<1024x128xbf16, #tpu.memory_space<vmem>>) attributes {dimension_semantics = [#tpu.dimension_semantics<parallel>], iteration_bounds = array<i64: 9>, scalar_prefetch = 0 : i64, scratch_operands = 0 : i64, tpu.core_type = #tpu.core_type<tc>, window_params = [{transform_indices = @transform_0, window_bounds = array<i64: 1024, 384>}, {pipeline_mode = #tpu.pipeline_mode<synchronous>, transform_indices = @transform_1, window_bounds = array<i64: 384, 128>}, {pipeline_mode = #tpu.pipeline_mode<synchronous>, transform_indices = @transform_2, window_bounds = array<i64: 1, 128>}, {transform_indices = @transform_3, window_bounds = array<i64: 1024, 128>}]} {
    %c0 = arith.constant 0 : index
    %c0_0 = arith.constant 0 : index
    %0 = vector.load %arg1[%c0, %c0_0] : memref<1024x384xbf16, #tpu.memory_space<vmem>>, vector<1024x384xbf16>
    %c0_1 = arith.constant 0 : index
    %c0_2 = arith.constant 0 : index
    %1 = vector.load %arg2[%c0_1, %c0_2] : memref<384x128xbf16, #tpu.memory_space<vmem>>, vector<384x128xbf16>
    %cst = arith.constant dense<0.000000e+00> : vector<1024x128xf32>
    %2 = tpu.matmul %0, %1, %cst {dimension_numbers = #tpu.dot_dimension_numbers<[1], [0], [0], [1], [0, 0, 1, 1], [], []>} : vector<1024x384xbf16>, vector<384x128xbf16>, vector<1024x128xf32> -> vector<1024x128xf32>
    %c0_3 = arith.constant 0 : index
    %c0_4 = arith.constant 0 : index
    %3 = vector.load %arg3[%c0_3, %c0_4] : memref<1x128xf32, #tpu.memory_space<vmem>>, vector<1x128xf32>
    %4 = vector.broadcast %3 : vector<1x128xf32> to vector<1024x128xf32>
    %5 = arith.addf %2, %4 : vector<1024x128xf32>
    %cst_5 = arith.constant 0.000000e+00 : f32
    %6 = vector.broadcast %cst_5 : f32 to vector<1024x128xf32>
    %7 = arith.maximumf %5, %6 : vector<1024x128xf32>
    %8 = arith.truncf %7 : vector<1024x128xf32> to vector<1024x128xbf16>
    %c0_6 = arith.constant 0 : index
    %c0_7 = arith.constant 0 : index
    %9 = vector.load %arg4[%c0_6, %c0_7] : memref<1024x128xbf16, #tpu.memory_space<vmem>>, vector<1024x128xbf16>
    tpu.vector_store %arg4[%c0_6, %c0_7], %8 {strides = array<i32>} : memref<1024x128xbf16, #tpu.memory_space<vmem>>, vector<1024x128xbf16>,
    return
  }
  func.func @transform_0(%arg0: i32) -> (i32, i32) {
    %c0_i32 = arith.constant 0 : i32
    %c0_i32_0 = arith.constant 0 : i32
    return %arg0, %c0_i32 : i32, i32
  }
  func.func @transform_1(%arg0: i32) -> (i32, i32) {
    %c0_i32 = arith.constant 0 : i32
    %c0_i32_0 = arith.constant 0 : i32
    %c0_i32_1 = arith.constant 0 : i32
    return %c0_i32, %c0_i32_0 : i32, i32
  }
  func.func @transform_2(%arg0: i32) -> (i32, i32) {
    %c0_i32 = arith.constant 0 : i32
    %c0_i32_0 = arith.constant 0 : i32
    %c0_i32_1 = arith.constant 0 : i32
    return %c0_i32, %c0_i32_0 : i32, i32
  }
  func.func @transform_3(%arg0: i32) -> (i32, i32) {
    %c0_i32 = arith.constant 0 : i32
    %c0_i32_0 = arith.constant 0 : i32
    return %arg0, %c0_i32 : i32, i32
  }
}

</mosaic_0001>

<bundles_post_ra>
// kernel: tpu_custom_call.1
= control target key start
LH: loop header
LB: loop body
LE: loop exit
PB: predicated region body
PF: predicated region fallthrough
CT: control target
= control target key end

     0   :  { %7 = vsyncpa [#allocation3], 0  ;;  %s690_s0 = inlined_call_operand.hbm [shape: f32[16,128], index: 0, kind: input, shape index: {}]   ;;  %s691_s1 = inlined_call_operand.hbm [shape: f32[8,128], index: 1, kind: input, shape index: {}]   ;;  %s692_s2 = inlined_call_operand.hbm [shape: f32[16,128], index: 2, kind: output, shape index: {}]  }
   0x1   :  { %9 = vsyncpa [#allocation3 + $0x1], 0 }
   0x2   :  { %10 = vsyncpa [#allocation6], 0 }
   0x3   :  { %11 = vsyncpa [#allocation4], 0 }
   0x4   :  { %13 = vsyncpa [#allocation4 + $0x1], 0  ;;  %s489_s9 = smov 0   ;;  %s491_s10 = smov 0  }
   0x5   :  { %s493_s11 = smov 0   ;;  %s495_s12 = smov 0  }
   0x6 LB: > { %s510_s13 = sadd.s32 4294967295, %s469_s12   ;;  %s270_s14 = sadd.s32 4294967294, %s469_s12   ;;  %s469_s12 = sphi %s495_s12, %s716_s12   ;;  %s465_s11 = sphi %s493_s11, %s715_s11   ;;  %s461_s10 = sphi %s491_s10, %s714_s10   ;;  %s457_s9 = sphi %s489_s9, %s713_s9  }
   0x7   : > { %p39_p0 = scmp.ne.s32.totalorder %s461_s10, %s457_s9  ;;  %p693_p1 = scmp.eq.s32.totalorder %s510_s13, 0 }
   0x8   : > { %p90_p3 = scmp.eq.s32.totalorder %s270_s14, 1  ;;  %p271_p5 = scmp.ge.s32.totalorder %s469_s12, 1 }
   0x9   : > { %p519_p4 = por %p693_p1, %p39_p0  ;;  %p97_p7 = scmp.lt.s32.totalorder %s469_s12, 3 }
   0xa   : > { %p524_p6 = por %p90_p3, %p39_p0  ;;  %s471_s18 = smov [#allocation5]  }
   0xb   : > { %s696_s15 = scalar_select %p519_p4, 1, 0 }
   0xc   : > { %s697_s16 = scalar_select %p524_p6, 1, 0 }
   0xd   : > { %p529_p8 = pnand %p271_p5, %p97_p7  ;;  %s110_s19 = sshll.u32 %s471_s18, 4  ;;  %s111_s19 = int_to_ptr.vmem [resolvable:$true] %s110_s19 }
   0xe   : > { %s537_s20 = sadd.s32 1, %s469_s12   ;;  %s26_s24 = sadd.s32 1, %s465_s11 }
   0xf   : > { %s698_s17 = scalar_select %p529_p8, 1, 0 }
  0x10   : > { %p292_p10 = pneg %p529_p8  ;;  %s23_s22 = ssub.s32 %s469_s12, %s537_s20 }
  0x11   : > { %p547_p12 = scmp.eq.s32.totalorder %s23_s22, 0  ;;  %s341_s27 = scalar_lea.hbm %s691_s1, 128 }
  0x12   : > { %p541_p11 = pnand %p292_p10, %p693_p1  ;;  %p342_p0 = scmp.ne.s32.totalorder %s691_s1, %s341_s27 }
  0x13   : > { %s700_s23 = scalar_select %p547_p12, 1, 0 }
  0x14   : > { %p343_p3 = pneg %p541_p11  ;;  %p348_p10 = scmp.lt.u32.totalorder %s341_s27, %s691_s1 }
  0x16   : > { %p344_p5 = pnand %p343_p3, %p342_p0 }
  0x18   : > { %p345_p7 = pneg %p344_p5 }
  0x1a   : > { %p350_p9 = pnand %p348_p10, %p345_p7 }
  0x1c   : > { %353 = shalt.err (!%p350_p9)
}
  0x1d   : > { %s354_s4 = scalar_lea.vmem %s111_s19, 128  ;;  %p362_p6 = scmp.lt.s32.totalorder %s111_s19, %s111_s19 }
  0x1e   : > { %p355_p1 = scmp.ne.s32.totalorder %s111_s19, %s354_s4  ;;  %p363_p4 = scmp.lt.s32.totalorder %s354_s4, %s354_s4 }
  0x20   : > { %p357_p2 = pnand %p355_p1, %p343_p3  ;;  %p364_p8 = por %p363_p4, %p362_p6 }
  0x22   : > { %p358_p13 = pneg %p357_p2 }
  0x24   : > { %p365_p12 = pnand %p364_p8, %p358_p13 }
  0x26   : > { %368 = shalt.err (!%p365_p12)
}
  0x27   : > { %295 = dma.hbm_to_vmem [thread:$0]  (!%p541_p11), %s691_s1, 128, %s111_s19, [#allocation6]  }
  0x28   : > { %p701_p1 = scmp.ne.s32.totalorder %s700_s23, 0  ;;  %p34_p2 = scmp.eq.s32.totalorder %s469_s12, 0 }
  0x29   : > { %p702_p4 = scmp.ne.s32.totalorder %s465_s11, %s461_s10  ;;  %p703_p6 = scmp.eq.s32.totalorder %s510_s13, 1 }
  0x2a   : > { %s573_s7 = scalar_select %p701_p1, %s465_s11, %s26_s24  }
  0x2b   : > { %p581_p8 = por %p703_p6, %p702_p4  ;;  %p305_p9 = scmp.lt.s32.totalorder %s469_s12, 2 }
  0x2c   : > { %s121_s14 = sand.u32 1, %s465_s11   ;;  %p705_p12 = pmov %p702_p4 }
  0x2d   : > { %s274_s18 = sshll.u32 %s121_s14, 3  ;;  %s275_s21 = sshll.u32 %s469_s12, 7 }
  0x2e   : > { %p35_p13 = por %p34_p2, %p705_p12  ;;  %s594_s19 = scalar_lea.hbm %s690_s0, %s275_s21 }
  0x2f   : > { %s125_s23 = scalar_lea.vmem [#allocation2], %s274_s18  ;;  %s122_s27 = scalar_lea.sflag [#allocation3], %s121_s14 }
  0x30   : > { %s132_s24 = sshll.u32 %s125_s23, 4  ;;  %p596_p11 = pnand %p305_p9, %p35_p13  ;;  %s600_s24 = int_to_ptr.vmem [resolvable:$true] %s132_s24 }
  0x31   : > { %s369_s28 = scalar_lea.hbm %s594_s19, 128  ;;  %s374_s3 = scalar_lea.hbm %s690_s0, 256 }
  0x32   : > { %p370_p0 = scmp.ne.s32.totalorder %s594_s19, %s369_s28  ;;  %p371_p3 = pneg %p596_p11 }
  0x33   : > { %p375_p10 = scmp.lt.u32.totalorder %s594_s19, %s690_s0  ;;  %p376_p1 = scmp.lt.u32.totalorder %s374_s3, %s369_s28 }
  0x34   : > { %p372_p5 = pnand %p371_p3, %p370_p0  ;;  %p378_p4 = scmp.lt.u32.totalorder %s369_s28, %s594_s19 }
  0x35   : > { %p377_p2 = por %p376_p1, %p375_p10 }
  0x36   : > { %p373_p7 = pneg %p372_p5 }
  0x37   : > { %p379_p6 = por %p378_p4, %p377_p2 }
  0x39   : > { %p380_p9 = pnand %p379_p6, %p373_p7 }
  0x3b   : > { %383 = shalt.err (!%p380_p9)
}
  0x3c   : > { %s384_s6 = scalar_lea.vmem %s600_s24, 128  ;;  %s472_s14 = smov [#allocation2]  }
  0x3d   : > { %p385_p12 = scmp.ne.s32.totalorder %s600_s24, %s384_s6  ;;  %s389_s18 = sshll.u32 %s472_s14, 4  ;;  %s390_s18 = int_to_ptr.vmem [resolvable:$false] %s389_s18 }
  0x3e   : > { %s391_s21 = scalar_lea.vmem %s390_s18, 256  ;;  %p392_p5 = scmp.lt.s32.totalorder %s600_s24, %s390_s18 }
  0x3f   : > { %p387_p13 = pnand %p385_p12, %p371_p3  ;;  %p393_p10 = scmp.lt.s32.totalorder %s391_s21, %s384_s6 }
  0x41   : > { %p388_p0 = pneg %p387_p13  ;;  %p394_p1 = por %p393_p10, %p392_p5 }
  0x43   : > { %p395_p2 = pnand %p394_p1, %p388_p0 }
  0x45   : > { %398 = shalt.err (!%p395_p2)
}
  0x46   : > { %299 = dma.hbm_to_vmem [thread:$0]  (!%p596_p11), %s594_s19, 128, %s600_s24, %s122_s27  }
  0x47   : > { %p707_p7 = scmp.ne.s32.totalorder %s698_s17, 0 }
  0x48   : > { %s630_s22 = sand.u32 (!%p707_p7), 1, %s461_s10   ;;  %p708_p3 = scmp.ne.s32.totalorder (!%p707_p7), %s696_s15, 0 }
  0x49   : > { %141 = sbr.rel (%p707_p7) target bundleno = 109 (0x6d), region = 28  ;;  %s277_s25 = sshll.u32 (!%p707_p7), %s630_s22, 3 }
  0x4a   : > { %s144_s23 = scalar_lea.sflag (!%p707_p7), [#allocation3], %s630_s22  ;;  %s147_s28 = scalar_lea.vmem (!%p707_p7), [#allocation2], %s277_s25 }
  0x50   : > { %444 = dma.done.wait (%p708_p3), %s144_s23, 128  }
  0x51   : > { %446 = vsyncadd (%p708_p3), %s144_s23, 4294967168  ;;  %p709_p4 = scmp.eq.s32.totalorder %s510_s13, 0 }
  0x53   : > { %448 = dma.done.wait (%p709_p4), [#allocation6], 128   ;;  %p710_p11 = pmov %p709_p4 }
  0x54   : > { %s171_s17 = scalar_lea.vmem [#allocation7], %s277_s25  ;;  %s281_s24 = sshll.u32 %s510_s13, 7  ;;  %v172_v0 = vld [vmem:[%s147_s28] sm:$0xff]  ;;  %v173_v1 = vld [vmem:[#allocation5] sm:$0xff] }
  0x55   : > { %450 = vsyncadd (%p710_p11), [#allocation6], 4294967168  ;;  %s190_s19 = sshll.u32 %s171_s17, 4  ;;  %v174_v2 = vadd.f32 %v173_v1, %v172_v0  ;;  %s648_s27 = scalar_lea.hbm %s692_s2, %s281_s24  ;;  %s643_s19 = int_to_ptr.vmem [resolvable:$true] %s190_s19 }
  0x56   : > { %s177_s29 = scalar_lea.sflag [#allocation4], %s630_s22  ;;  %s399_s30 = scalar_lea.vmem %s643_s19, 128 }
  0x57   : > { %175 = vst [vmem:[%s171_s17] sm:$0xff] %v174_v2  ;;  %p400_p6 = scmp.ne.s32.totalorder %s643_s19, %s399_s30  ;;  %s473_s13 = smov [#allocation7]  }
  0x58   : > { %s403_s3 = sshll.u32 %s473_s13, 4  ;;  %s404_s3 = int_to_ptr.vmem [resolvable:$false] %s403_s3 }
  0x59   : > { %p401_p9 = pnand %p400_p6, %p581_p8  ;;  %s405_s4 = scalar_lea.vmem %s404_s3, 256 }
  0x5a   : > { %p406_p13 = scmp.lt.s32.totalorder %s643_s19, %s404_s3  ;;  %p407_p0 = scmp.lt.s32.totalorder %s405_s4, %s399_s30 }
  0x5b   : > { %p402_p12 = pneg %p401_p9 }
  0x5c   : > { %p408_p5 = por %p407_p0, %p406_p13 }
  0x5e   : > { %p409_p10 = pnand %p408_p5, %p402_p12 }
  0x60   : > { %412 = shalt.err (!%p409_p10)
}
  0x61   : > { %s413_s5 = scalar_lea.hbm %s648_s27, 128  ;;  %s417_s18 = scalar_lea.hbm %s692_s2, 256 }
  0x62   : > { %p414_p1 = scmp.ne.s32.totalorder %s648_s27, %s413_s5  ;;  %p418_p3 = scmp.lt.u32.totalorder %s648_s27, %s692_s2 }
  0x63   : > { %p419_p4 = scmp.lt.u32.totalorder %s417_s18, %s413_s5  ;;  %p421_p6 = scmp.lt.u32.totalorder %s413_s5, %s648_s27 }
  0x64   : > { %p415_p2 = pnand %p414_p1, %p581_p8 }
  0x65   : > { %p420_p11 = por %p419_p4, %p418_p3 }
  0x66   : > { %p416_p7 = pneg %p415_p2 }
  0x67   : > { %p422_p9 = por %p421_p6, %p420_p11 }
  0x69   : > { %p423_p12 = pnand %p422_p9, %p416_p7 }
  0x6b   : > { %426 = shalt.err (!%p423_p12)
}
  0x6c   : > { %290 = dma.vmem_to_hbm [thread:$0]  (%p581_p8), %s643_s19, 128, %s648_s27, %s177_s29  }
  0x6d PF: > { %s202_s25 = sand.u32 1, %s457_s9   ;;  %p711_p13 = scmp.ne.s32.totalorder %s697_s16, 0 }
  0x6e   : > { %p712_p0 = scmp.ge.s32.totalorder %s469_s12, 2  ;;  %s203_s23 = scalar_lea.sflag [#allocation4], %s202_s25 }
  0x70   : > { %p301_p5 = pnand %p712_p0, %p711_p13 }
  0x72   : > { %452 = dma.done.wait (!%p301_p5), %s203_s23, 128  }
  0x73   : > { %454 = vsyncadd (!%p301_p5), %s203_s23, 4294967168  ;;  %p16_p10 = scmp.ge.s32.totalorder %s537_s20, 4   ;;  %s713_s9 = smov %s461_s10 }
  0x74   : > { %s714_s10 = smov %s465_s11  ;;  %s715_s11 = smov %s573_s7 }
  0x75   : > { %s716_s12 = smov %s537_s20  ;;  %18 = sbr.rel (!%p16_p10) target bundleno = 6 (0x6), region = 77 }
  0x7c   :  { %208 = vsyncpa [#allocation3], 1 }
  0x7d   :  { %210 = vsyncpa [#allocation3 + $0x1], 1 }
  0x7e   :  { %211 = vsyncpa [#allocation6], 1 }
  0x7f   :  { %212 = vsyncpa [#allocation4], 1 }
  0x80   :  { %214 = vsyncpa [#allocation4 + $0x1], 1 }

// kernel: tpu_custom_call.1
= control target key start
LH: loop header
LB: loop body
LE: loop exit
PB: predicated region body
PF: predicated region fallthrough
CT: control target
= control target key end

     0   :  { %8 = vsyncpa [#allocation3], 0  ;;  %s6296_s0 = inlined_call_operand.hbm [shape: bf16[9216,384], index: 0, kind: input, shape index: {}]   ;;  %s6297_s1 = inlined_call_operand.hbm [shape: bf16[384,128], index: 1, kind: input, shape index: {}]   ;;  %s6298_s2 = inlined_call_operand.hbm [shape: f32[1,128], index: 2, kind: input, shape index: {}]   ;;  %s6299_s3 = inlined_call_operand.hbm [shape: bf16[9216,128], index: 3, kind: output, shape index: {}]  }
   0x1   :  { %10 = vsyncpa [#allocation3 + $0x1], 0 }
   0x2   :  { %11 = vsyncpa [#allocation6], 0 }
   0x3   :  { %12 = vsyncpa [#allocation4], 0 }
   0x4   :  { %14 = vsyncpa [#allocation4 + $0x1], 0  ;;  %s5332_s12 = smov 0   ;;  %s5334_s13 = smov 0  }
   0x5   :  { %s5336_s14 = smov 0   ;;  %s5338_s15 = smov 0  }
   0x6 LB: > { %s5353_s16 = sadd.s32 4294967295, %s5299_s15   ;;  %s3663_s17 = sadd.s32 4294967294, %s5299_s15   ;;  %s5299_s15 = sphi %s5338_s15, %s6356_s15   ;;  %s5295_s14 = sphi %s5336_s14, %s6355_s14   ;;  %s5291_s13 = sphi %s5334_s13, %s6354_s13   ;;  %s5287_s12 = sphi %s5332_s12, %s6353_s12  }
   0x7   : > { %p40_p0 = scmp.ne.s32.totalorder %s5291_s13, %s5287_s12  ;;  %p6300_p1 = scmp.eq.s32.totalorder %s5353_s16, 0 }
   0x8   : > { %p112_p3 = scmp.eq.s32.totalorder %s3663_s17, 8  ;;  %p3664_p5 = scmp.ge.s32.totalorder %s5299_s15, 1 }
   0x9   : > { %p5362_p4 = por %p6300_p1, %p40_p0  ;;  %p119_p7 = scmp.lt.s32.totalorder %s5299_s15, 10 }
   0xa   : > { %p5367_p6 = por %p112_p3, %p40_p0  ;;  %s5301_s21 = smov [#allocation5]  }
   0xb   : > { %s6303_s18 = scalar_select %p5362_p4, 1, 0 }
   0xc   : > { %s6304_s19 = scalar_select %p5367_p6, 1, 0 }
   0xd   : > { %p5372_p8 = pnand %p3664_p5, %p119_p7  ;;  %s131_s22 = sshll.u32 %s5301_s21, 4  ;;  %s132_s22 = int_to_ptr.vmem [resolvable:$true] %s131_s22 }
   0xe   : > { %s5302_s24 = smov [#allocation7]   ;;  %s5143_s28 = scalar_lea.hbm %s6297_s1, 3072 }
   0xf   : > { %s6305_s20 = scalar_select %p5372_p8, 1, 0 }
  0x10   : > { %p4800_p9 = pneg %p5372_p8  ;;  %s145_s25 = sshll.u32 %s5302_s24, 4  ;;  %s5384_s25 = int_to_ptr.vmem [resolvable:$true] %s145_s25 }
  0x11   : > { %p5144_p11 = scmp.ne.s32.totalorder %s6297_s1, %s5143_s28  ;;  %p5150_p3 = scmp.lt.u32.totalorder %s5143_s28, %s6297_s1 }
  0x12   : > { %p5380_p10 = pnand %p4800_p9, %p6300_p1 }
  0x14   : > { %p5145_p12 = pneg %p5380_p10 }
  0x16   : > { %p5146_p13 = pnand %p5145_p12, %p5144_p11 }
  0x18   : > { %p5147_p0 = pneg %p5146_p13 }
  0x1a   : > { %p5152_p5 = pnand %p5150_p3, %p5147_p0 }
  0x1c   : > { %5155 = shalt.err (!%p5152_p5)
}
  0x1d   : > { %s5156_s6 = scalar_lea.vmem %s132_s22, 3072  ;;  %p5164_p2 = scmp.lt.s32.totalorder %s132_s22, %s132_s22 }
  0x1e   : > { %p5157_p7 = scmp.ne.s32.totalorder %s132_s22, %s5156_s6  ;;  %p5165_p6 = scmp.lt.s32.totalorder %s5156_s6, %s5156_s6 }
  0x20   : > { %p5159_p9 = pnand %p5157_p7, %p5145_p12  ;;  %p5166_p4 = por %p5165_p6, %p5164_p2 }
  0x22   : > { %p5160_p1 = pneg %p5159_p9 }
  0x24   : > { %p5167_p8 = pnand %p5166_p4, %p5160_p1 }
  0x26   : > { %5170 = shalt.err (!%p5167_p8)
}
  0x27   : > { %s5303_s7 = smov 64   ;;  %s5304_s8 = smov 4  }
  0x28   : > { %4803 = dma.hbm_to_vmem [thread:$0]  (!%p5380_p10), %s6297_s1, 3072, %s132_s22, [#allocation6], %s5303_s7, %s5303_s7, %s5304_s8  }
  0x29   : > { %s5171_s21 = scalar_lea.hbm %s6298_s2, 16 }
  0x2a   : > { %p5172_p11 = scmp.ne.s32.totalorder %s6298_s2, %s5171_s21  ;;  %p5178_p4 = scmp.lt.u32.totalorder %s5171_s21, %s6298_s2 }
  0x2c   : > { %p5174_p1 = pnand %p5172_p11, %p5145_p12 }
  0x2e   : > { %p5175_p2 = pneg %p5174_p1 }
  0x30   : > { %p5180_p6 = pnand %p5178_p4, %p5175_p2 }
  0x32   : > { %5183 = shalt.err (!%p5180_p6)
}
  0x33   : > { %s5184_s22 = scalar_lea.vmem %s5384_s25, 16  ;;  %s5191_s29 = scalar_lea.vmem %s5384_s25, 32 }
  0x34   : > { %p5185_p8 = scmp.ne.s32.totalorder %s5384_s25, %s5184_s22  ;;  %p5192_p3 = scmp.lt.s32.totalorder %s5384_s25, %s5384_s25 }
  0x35   : > { %p5193_p5 = scmp.lt.s32.totalorder %s5191_s29, %s5184_s22 }
  0x36   : > { %p5187_p13 = pnand %p5185_p8, %p5145_p12 }
  0x37   : > { %p5194_p7 = por %p5193_p5, %p5192_p3 }
  0x38   : > { %p5188_p0 = pneg %p5187_p13 }
  0x3a   : > { %p5195_p9 = pnand %p5194_p7, %p5188_p0 }
  0x3c   : > { %5198 = shalt.err (!%p5195_p9)
}
  0x3d   : > { %4806 = dma.hbm_to_vmem [thread:$0]  (!%p5380_p10), %s6298_s2, 16, %s5384_s25, [#allocation6]  }
  0x3e   : > { %s5435_s5 = sadd.s32 1, %s5299_s15   ;;  %s27_s23 = sadd.s32 1, %s5295_s14 }
  0x3f   : > { %s24_s6 = ssub.s32 %s5299_s15, %s5435_s5  ;;  %p34_p12 = scmp.ne.s32.totalorder %s5295_s14, %s5291_s13 }
  0x40   : > { %p25_p11 = scmp.eq.s32.totalorder %s24_s6, 0  ;;  %p35_p1 = scmp.eq.s32.totalorder %s5299_s15, 0 }
  0x41   : > { %p6307_p2 = scmp.eq.s32.totalorder %s5353_s16, 8  ;;  %p4817_p6 = scmp.lt.s32.totalorder %s5299_s15, 9 }
  0x42   : > { %s5451_s8 = scalar_select %p25_p11, %s5295_s14, %s27_s23  }
  0x43   : > { %p5445_p4 = por %p6307_p2, %p34_p12  ;;  %p36_p8 = por %p35_p1, %p34_p12 }
  0x44   : > { %s156_s9 = sand.u32 1, %s5295_s14   ;;  %s4786_s25 = smul.u32 24576, %s5299_s15 }
  0x45   : > { %s4785_s10 = smul.u32 1536, %s156_s9  ;;  %p5455_p10 = pnand %p4817_p6, %p36_p8 }
  0x46   : > { %s5462_s24 = scalar_lea.hbm %s6296_s0, %s4786_s25  ;;  %s5466_s28 = scalar_lea.sflag [#allocation3], %s156_s9 }
  0x47   : > { %s160_s26 = scalar_lea.vmem [#allocation2], %s4785_s10  ;;  %s5199_s22 = scalar_lea.hbm %s5462_s24, 24576 }
  0x48   : > { %s168_s27 = sshll.u32 %s160_s26, 4  ;;  %p5200_p13 = scmp.ne.s32.totalorder %s5462_s24, %s5199_s22  ;;  %s5464_s27 = int_to_ptr.vmem [resolvable:$true] %s168_s27 }
  0x49   : > { %p5201_p0 = pneg %p5455_p10  ;;  %s5204_s4 = scalar_lea.hbm %s6296_s0, 221184 }
  0x4a   : > { %p5205_p7 = scmp.lt.u32.totalorder %s5462_s24, %s6296_s0  ;;  %p5206_p9 = scmp.lt.u32.totalorder %s5204_s4, %s5199_s22 }
  0x4b   : > { %p5202_p3 = pnand %p5201_p0, %p5200_p13  ;;  %p5208_p11 = scmp.lt.u32.totalorder %s5199_s22, %s5462_s24 }
  0x4c   : > { %p5207_p12 = por %p5206_p9, %p5205_p7 }
  0x4d   : > { %p5203_p5 = pneg %p5202_p3 }
  0x4e   : > { %p5209_p1 = por %p5208_p11, %p5207_p12 }
  0x50   : > { %p5210_p2 = pnand %p5209_p1, %p5203_p5 }
  0x52   : > { %5213 = shalt.err (!%p5210_p2)
}
  0x53   : > { %s5214_s9 = scalar_lea.vmem %s5464_s27, 24576  ;;  %s5305_s10 = smov [#allocation2]  }
  0x54   : > { %p5215_p6 = scmp.ne.s32.totalorder %s5464_s27, %s5214_s9  ;;  %s5219_s25 = sshll.u32 %s5305_s10, 4  ;;  %s5220_s25 = int_to_ptr.vmem [resolvable:$false] %s5219_s25 }
  0x55   : > { %s5221_s17 = scalar_lea.vmem %s5220_s25, 49152  ;;  %p5222_p3 = scmp.lt.s32.totalorder %s5464_s27, %s5220_s25 }
  0x56   : > { %p5217_p8 = pnand %p5215_p6, %p5201_p0  ;;  %p5223_p7 = scmp.lt.s32.totalorder %s5221_s17, %s5214_s9 }
  0x58   : > { %p5218_p13 = pneg %p5217_p8  ;;  %p5224_p9 = por %p5223_p7, %p5222_p3 }
  0x5a   : > { %p5225_p12 = pnand %p5224_p9, %p5218_p13 }
  0x5c   : > { %5228 = shalt.err (!%p5225_p12)
}
  0x5d   : > { %s5306_s21 = smov 192   ;;  %s5307_s26 = smov 12  }
  0x5e   : > { %4810 = dma.hbm_to_vmem [thread:$0]  (!%p5455_p10), %s5462_s24, 24576, %s5464_s27, %s5466_s28, %s5306_s21, %s5306_s21, %s5307_s26  }
  0x5f   : > { %p6310_p0 = scmp.ne.s32.totalorder %s6305_s20, 0 }
  0x61   : > { %180 = sbr.rel (%p6310_p0) target bundleno = 790 (0x316), region = 32 }
  0x68   : > { %s5497_s22 = sand.u32 1, %s5291_s13   ;;  %p6311_p5 = scmp.ne.s32.totalorder %s6303_s18, 0 }
  0x69   : > { %s4787_s29 = smul.u32 1536, %s5497_s22  ;;  %s183_s30 = scalar_lea.sflag [#allocation3], %s5497_s22 }
  0x6b   : > { %s5501_s4 = scalar_lea.vmem [#allocation2], %s4787_s29 }
  0x6c   : > { %5274 = dma.done.wait (%p6311_p5), %s183_s30, 24576  }
  0x6d   : > { %5276 = vsyncadd (%p6311_p5), %s183_s30, 4294942720  ;;  %p6312_p10 = scmp.eq.s32.totalorder %s5353_s16, 0 }
  0x6f   : > { %5278 = dma.done.wait (%p6312_p10), [#allocation6], 3088   ;;  %p6313_p11 = pmov %p6312_p10 }
  0x70   : > { %v5308_v0 = vmov 0   ;;  %v4862_v1 = vld [vmem:[#allocation5] sm:$0xff]   ;;  %v4863_v2 = vld [vmem:[#allocation5 + $0x8] sm:$0xff]   ;;  %v4864_v3 = vld [vmem:[#allocation5 + $0x10] sm:$0xff]   ;;  %s3674_s18 = sshll.u32 %s5497_s22, 9  ;;  %s4153_s11 = sshll.u32 %s5353_s16, 13 }
  0x71   : > { %5280 = vsyncadd (%p6313_p11), [#allocation6], 4294964208  ;;  %1699 = vmatprep.subr.bf16.mxu0 %v5308_v0  ;;  %4753 = vmatprep.subr.bf16.mxu1 %v5308_v0  ;;  %v4865_v4 = vld [vmem:[#allocation5 + $0x18] sm:$0xff]   ;;  %v4866_v5 = vld [vmem:[#allocation5 + $0x20] sm:$0xff]   ;;  %s5872_s20 = scalar_lea.vmem [#allocation8], %s3674_s18  ;;  %s6248_s23 = scalar_lea.hbm %s6299_s3, %s4153_s11 }
  0x72   : > { %1700 = vmatpush1.bf16.msra.mxu0 %v4862_v1  ;;  %4769 = vmatpush1.bf16.msra.mxu1 %v4862_v1  ;;  %v4880_v6 = vld [vmem:[%s5501_s4 + $0x4] ss:$12 sps:$4 sm:$0xff]   ;;  %v4867_v7 = vld [vmem:[#allocation5 + $0x28] sm:$0xff]   ;;  %v4869_v10 = vld [vmem:[#allocation5 + $0x38] sm:$0xff]   ;;  %s3571_s24 = sshll.u32 %s5872_s20, 4  ;;  %s3558_s16 = scalar_lea.sflag [#allocation4], %s5497_s22  ;;  %s6250_s24 = int_to_ptr.vmem [resolvable:$true] %s3571_s24 }
  0x73   : > { %1701 = vmatprep.subr.bf16.mxu0 %v5308_v0  ;;  %4754 = vmatprep.subr.bf16.mxu1 %v5308_v0  ;;  %v4883_v8 = vld [vmem:[%s5501_s4 + $0x484] ss:$12 sps:$4 sm:$0xff]   ;;  %v4871_v12 = vld [vmem:[#allocation5 + $0x48] sm:$0xff]   ;;  %v4873_v14 = vld [vmem:[#allocation5 + $0x58] sm:$0xff]   ;;  %s5229_s6 = scalar_lea.vmem %s6250_s24, 8192  ;;  %s5309_s9 = smov [#allocation8]  }
  0x74   : > { %1731 = vmatprep.mubr.bf16.mxu0 %v4880_v6  ;;  %2115 = vmatprep.mubr.bf16.mxu1 %v4883_v8  ;;  %v4868_v9 = vld [vmem:[#allocation5 + $0x30] sm:$0xff]   ;;  %v4870_v11 = vld [vmem:[#allocation5 + $0x40] sm:$0xff]   ;;  %v4875_v16 = vld [vmem:[#allocation5 + $0x68] sm:$0xff]   ;;  %p5230_p1 = scmp.ne.s32.totalorder %s6250_s24, %s5229_s6  ;;  %s5233_s10 = sshll.u32 %s5309_s9, 4  ;;  %s5234_s10 = int_to_ptr.vmem [resolvable:$false] %s5233_s10 }
  0x75   : > { %v4872_v13 = vld [vmem:[#allocation5 + $0x50] sm:$0xff]   ;;  %v4874_v15 = vld [vmem:[#allocation5 + $0x60] sm:$0xff]   ;;  %v4877_v18 = vld [vmem:[#allocation5 + $0x78] sm:$0xff]   ;;  %s5235_s25 = scalar_lea.vmem %s5234_s10, 16384  ;;  %p5236_p8 = scmp.lt.s32.totalorder %s6250_s24, %s5234_s10 }
  0x76   : > { %1702 = vmatpush1.bf16.msra.mxu0 %v4863_v2  ;;  %4770 = vmatpush1.bf16.msra.mxu1 %v4863_v2  ;;  %v4876_v17 = vld [vmem:[#allocation5 + $0x70] sm:$0xff]   ;;  %v4884_v19 = vld [vmem:[#allocation5 + $0x80] sm:$0xff]   ;;  %v4885_v22 = vld [vmem:[%s5501_s4 + $0x1c] ss:$12 sps:$4 sm:$0xff]   ;;  %p5231_p2 = pnand %p5230_p1, %p5445_p4  ;;  %p5237_p13 = scmp.lt.s32.totalorder %s5235_s25, %s5229_s6 }
  0x77   : > { %1703 = vmatprep.subr.bf16.mxu0 %v5308_v0  ;;  %4755 = vmatprep.subr.bf16.mxu1 %v5308_v0  ;;  %v4878_v20 = vld [vmem:[%s5501_s4] ss:$12 sps:$4 sm:$0xff]   ;;  %v4887_v23 = vld [vmem:[%s5501_s4 + $0x49c] ss:$12 sps:$4 sm:$0xff]   ;;  %v4910_v25 = vld [vmem:[#allocation5 + $0x90] sm:$0xff]  }
  0x78   : > { %v4881_v21 = vld [vmem:[%s5501_s4 + $0x480] ss:$12 sps:$4 sm:$0xff]   ;;  %v4889_v26 = vld [vmem:[%s5501_s4 + $0x18] ss:$12 sps:$4 sm:$0xff]   ;;  %v4895_v31 = vld [vmem:[%s5501_s4 + $0x30] ss:$12 sps:$4 sm:$0xff]   ;;  %p5232_p6 = pneg %p5231_p2  ;;  %p5238_p3 = por %p5237_p13, %p5236_p8 }
  0x79   : > { %v4897_v24 = vld [vmem:[#allocation5 + $0x88] sm:$0xff]   ;;  %v4890_v27 = vld [vmem:[%s5501_s4 + $0x498] ss:$12 sps:$4 sm:$0xff]   ;;  %v4891_v28 = vld [vmem:[%s5501_s4 + $0x34] ss:$12 sps:$4 sm:$0xff]  }
  0x7a   : > { %1704 = vmatpush1.bf16.msra.mxu0 %v4864_v3  ;;  %4771 = vmatpush1.bf16.msra.mxu1 %v4864_v3  ;;  %v4893_v29 = vld [vmem:[%s5501_s4 + $0x4b4] ss:$12 sps:$4 sm:$0xff]   ;;  %v4923_v30 = vld [vmem:[#allocation5 + $0x98] sm:$0xff]   ;;  %v4949_v36 = vld [vmem:[#allocation5 + $0xa8] sm:$0xff]   ;;  %p5239_p7 = pnand %p5238_p3, %p5232_p6 }
  0x7b   : > { %1705 = vmatprep.subr.bf16.mxu0 %v5308_v0  ;;  %4756 = vmatprep.subr.bf16.mxu1 %v5308_v0  ;;  %v4896_v32 = vld [vmem:[%s5501_s4 + $0x4b0] ss:$12 sps:$4 sm:$0xff]   ;;  %v4936_v33 = vld [vmem:[#allocation5 + $0xa0] sm:$0xff]   ;;  %v4898_v34 = vld [vmem:[%s5501_s4 + $0x4c] ss:$12 sps:$4 sm:$0xff]  }
  0x7c   : > { %v4900_v35 = vld [vmem:[%s5501_s4 + $0x4cc] ss:$12 sps:$4 sm:$0xff]   ;;  %v4962_v37 = vld [vmem:[#allocation5 + $0xb0] sm:$0xff]   ;;  %v4911_v45 = vld [vmem:[%s5501_s4 + $0x7c] ss:$12 sps:$4 sm:$0xff]  }
  0x7d   : > { %v4902_v38 = vld [vmem:[%s5501_s4 + $0x48] ss:$12 sps:$4 sm:$0xff]   ;;  %v4904_v40 = vld [vmem:[%s5501_s4 + $0x64] ss:$12 sps:$4 sm:$0xff]   ;;  %v4975_v42 = vld [vmem:[#allocation5 + $0xb8] sm:$0xff]  }
  0x7e   : > { %1706 = vmatpush1.bf16.msra.mxu0 %v4865_v4  ;;  %4772 = vmatpush1.bf16.msra.mxu1 %v4865_v4  ;;  %v4903_v39 = vld [vmem:[%s5501_s4 + $0x4c8] ss:$12 sps:$4 sm:$0xff]   ;;  %v4906_v41 = vld [vmem:[%s5501_s4 + $0x4e4] ss:$12 sps:$4 sm:$0xff]   ;;  %v4908_v43 = vld [vmem:[%s5501_s4 + $0x60] ss:$12 sps:$4 sm:$0xff]  }
  0x7f   : > { %1707 = vmatprep.subr.bf16.mxu0 %v5308_v0  ;;  %4757 = vmatprep.subr.bf16.mxu1 %v5308_v0  ;;  %v4909_v44 = vld [vmem:[%s5501_s4 + $0x4e0] ss:$12 sps:$4 sm:$0xff]   ;;  %v4913_v46 = vld [vmem:[%s5501_s4 + $0x4fc] ss:$12 sps:$4 sm:$0xff]   ;;  %v4915_v47 = vld [vmem:[%s5501_s4 + $0x78] ss:$12 sps:$4 sm:$0xff]  }
  0x80   : > { %v4916_v48 = vld [vmem:[%s5501_s4 + $0x4f8] ss:$12 sps:$4 sm:$0xff]   ;;  %v4917_v49 = vld [vmem:[%s5501_s4 + $0x94] ss:$12 sps:$4 sm:$0xff]   ;;  %v4921_v51 = vld [vmem:[%s5501_s4 + $0x90] ss:$12 sps:$4 sm:$0xff]  }
  0x81   : > { %v4919_v50 = vld [vmem:[%s5501_s4 + $0x514] ss:$12 sps:$4 sm:$0xff]   ;;  %v4922_v52 = vld [vmem:[%s5501_s4 + $0x510] ss:$12 sps:$4 sm:$0xff]   ;;  %v4924_v53 = vld [vmem:[%s5501_s4 + $0xac] ss:$12 sps:$4 sm:$0xff]  }
  0x82   : > { %1708 = vmatpush1.bf16.msra.mxu0 %v4866_v5  ;;  %4773 = vmatpush1.bf16.msra.mxu1 %v4866_v5  ;;  %v4926_v54 = vld [vmem:[%s5501_s4 + $0x52c] ss:$12 sps:$4 sm:$0xff]   ;;  %v4928_v55 = vld [vmem:[%s5501_s4 + $0xa8] ss:$12 sps:$4 sm:$0xff]   ;;  %v4930_v57 = vld [vmem:[%s5501_s4 + $0xc4] ss:$12 sps:$4 sm:$0xff]  }
  0x83   : > { %1709 = vmatprep.subr.bf16.mxu0 %v5308_v0  ;;  %4758 = vmatprep.subr.bf16.mxu1 %v5308_v0  ;;  %v4929_v56 = vld [vmem:[%s5501_s4 + $0x528] ss:$12 sps:$4 sm:$0xff]   ;;  %v4932_v58 = vld [vmem:[%s5501_s4 + $0x544] ss:$12 sps:$4 sm:$0xff]   ;;  %v4934_v59 = vld [vmem:[%s5501_s4 + $0xc0] ss:$12 sps:$4 sm:$0xff]  }
  0x84   : > { %v4935_v60 = vld [vmem:[%s5501_s4 + $0x540] ss:$12 sps:$4 sm:$0xff]   ;;  %v4937_v61 = vld [vmem:[%s5501_s4 + $0xdc] ss:$12 sps:$4 sm:$0xff]   ;;  %v4941_v63 = vld [vmem:[%s5501_s4 + $0xd8] ss:$12 sps:$4 sm:$0xff]  }
  0x85   : > { %v4939_v62 = vld [vmem:[%s5501_s4 + $0x55c] ss:$12 sps:$4 sm:$0xff]   ;;  %v4943_v1 = vld [vmem:[%s5501_s4 + $0xf4] ss:$12 sps:$4 sm:$0xff]   ;;  %v4950_v5 = vld [vmem:[%s5501_s4 + $0x10c] ss:$12 sps:$4 sm:$0xff]  }
  0x86   : > { %1710 = vmatpush1.bf16.msra.mxu0 %v4867_v7  ;;  %4774 = vmatpush1.bf16.msra.mxu1 %v4867_v7  ;;  %v4945_v2 = vld [vmem:[%s5501_s4 + $0x574] ss:$12 sps:$4 sm:$0xff]   ;;  %v4947_v3 = vld [vmem:[%s5501_s4 + $0xf0] ss:$12 sps:$4 sm:$0xff]   ;;  %v4952_v6 = vld [vmem:[%s5501_s4 + $0x58c] ss:$12 sps:$4 sm:$0xff]  }
  0x87   : > { %1711 = vmatprep.subr.bf16.mxu0 %v5308_v0  ;;  %4759 = vmatprep.subr.bf16.mxu1 %v5308_v0  ;;  %v4948_v4 = vld [vmem:[%s5501_s4 + $0x570] ss:$12 sps:$4 sm:$0xff]   ;;  %v4954_v7 = vld [vmem:[%s5501_s4 + $0x108] ss:$12 sps:$4 sm:$0xff]  }
  0x88   : > { %v4955_v8 = vld [vmem:[%s5501_s4 + $0x588] ss:$12 sps:$4 sm:$0xff]  }
  0x8a   : > { %1712 = vmatpush1.bf16.msra.mxu0 %v4868_v9  ;;  %4775 = vmatpush1.bf16.msra.mxu1 %v4868_v9  ;;  %v4956_v9 = vld [vmem:[%s5501_s4 + $0x124] ss:$12 sps:$4 sm:$0xff]  }
  0x8b   : > { %1713 = vmatprep.subr.bf16.mxu0 %v5308_v0  ;;  %4760 = vmatprep.subr.bf16.mxu1 %v5308_v0 }
  0x8e   : > { %1714 = vmatpush1.bf16.msra.mxu0 %v4869_v10  ;;  %4776 = vmatpush1.bf16.msra.mxu1 %v4869_v10  ;;  %v4958_v10 = vld [vmem:[%s5501_s4 + $0x5a4] ss:$12 sps:$4 sm:$0xff]  }
  0x8f   : > { %1715 = vmatprep.subr.bf16.mxu0 %v5308_v0  ;;  %4761 = vmatprep.subr.bf16.mxu1 %v5308_v0 }
  0x92   : > { %1716 = vmatpush1.bf16.msra.mxu0 %v4870_v11  ;;  %4777 = vmatpush1.bf16.msra.mxu1 %v4870_v11  ;;  %v4960_v11 = vld [vmem:[%s5501_s4 + $0x120] ss:$12 sps:$4 sm:$0xff]  }
  0x93   : > { %1717 = vmatprep.subr.bf16.mxu0 %v5308_v0  ;;  %4762 = vmatprep.subr.bf16.mxu1 %v5308_v0 }
  0x96   : > { %1718 = vmatpush1.bf16.msra.mxu0 %v4871_v12  ;;  %4778 = vmatpush1.bf16.msra.mxu1 %v4871_v12  ;;  %v4961_v12 = vld [vmem:[%s5501_s4 + $0x5a0] ss:$12 sps:$4 sm:$0xff]  }
  0x97   : > { %1719 = vmatprep.subr.bf16.mxu0 %v5308_v0  ;;  %4763 = vmatprep.subr.bf16.mxu1 %v5308_v0 }
  0x9a   : > { %1720 = vmatpush1.bf16.msra.mxu0 %v4872_v13  ;;  %4779 = vmatpush1.bf16.msra.mxu1 %v4872_v13  ;;  %v4963_v13 = vld [vmem:[%s5501_s4 + $0x13c] ss:$12 sps:$4 sm:$0xff]  }
  0x9b   : > { %1721 = vmatprep.subr.bf16.mxu0 %v5308_v0  ;;  %4764 = vmatprep.subr.bf16.mxu1 %v5308_v0 }
  0x9e   : > { %1722 = vmatpush1.bf16.msra.mxu0 %v4873_v14  ;;  %4780 = vmatpush1.bf16.msra.mxu1 %v4873_v14  ;;  %v4965_v14 = vld [vmem:[%s5501_s4 + $0x5bc] ss:$12 sps:$4 sm:$0xff]  }
  0x9f   : > { %1723 = vmatprep.subr.bf16.mxu0 %v5308_v0  ;;  %4765 = vmatprep.subr.bf16.mxu1 %v5308_v0 }
  0xa2   : > { %1724 = vmatpush1.bf16.msra.mxu0 %v4874_v15  ;;  %4781 = vmatpush1.bf16.msra.mxu1 %v4874_v15  ;;  %v4967_v15 = vld [vmem:[%s5501_s4 + $0x138] ss:$12 sps:$4 sm:$0xff]  }
  0xa3   : > { %1725 = vmatprep.subr.bf16.mxu0 %v5308_v0  ;;  %4766 = vmatprep.subr.bf16.mxu1 %v5308_v0 }
  0xa6   : > { %1726 = vmatpush1.bf16.msra.mxu0 %v4875_v16  ;;  %4782 = vmatpush1.bf16.msra.mxu1 %v4875_v16  ;;  %v4968_v16 = vld [vmem:[%s5501_s4 + $0x5b8] ss:$12 sps:$4 sm:$0xff]  }
  0xa7   : > { %1727 = vmatprep.subr.bf16.mxu0 %v5308_v0  ;;  %4767 = vmatprep.subr.bf16.mxu1 %v5308_v0 }
  0xaa   : > { %1728 = vmatpush1.bf16.msra.mxu0 %v4876_v17  ;;  %4783 = vmatpush1.bf16.msra.mxu1 %v4876_v17  ;;  %v4969_v17 = vld [vmem:[%s5501_s4 + $0x154] ss:$12 sps:$4 sm:$0xff]  }
  0xab   : > { %1729 = vmatprep.subr.bf16.mxu0 %v5308_v0  ;;  %4768 = vmatprep.subr.bf16.mxu1 %v5308_v0  ;;  %v4942_v0 = vld [vmem:[%s5501_s4 + $0x558] ss:$12 sps:$4 sm:$0xff]  }
  0xae   : > { %1730 = vmatpush1.bf16.msra.mxu0 %v4877_v18  ;;  %4784 = vmatpush1.bf16.msra.mxu1 %v4877_v18  ;;  %v4971_v18 = vld [vmem:[%s5501_s4 + $0x5d4] ss:$12 sps:$4 sm:$0xff]  }
  0xaf   : > { %4609 = vmatprep.subr.bf16.mxu1 %v4884_v19 }
  0xb1   : > { %1732 = vmatmul.mubr.bf16.vlgmr.msra.gmra.mrb[0].mxu0 %v4878_v20  ;;  %2116 = vmatmul.mubr.bf16.vlgmr.msra.gmra.mrb[0].mxu1 %v4881_v21  ;;  %v4974_v20 = vld [vmem:[%s5501_s4 + $0x5d0] ss:$12 sps:$4 sm:$0xff]   ;;  %v4976_v21 = vld [vmem:[%s5501_s4 + $0x16c] ss:$12 sps:$4 sm:$0xff]  }
  0xb2   : > { %4610 = vmatpush3.bf16.msra.mxu1 %v4884_v19  ;;  %1739 = vmatprep.mubr.bf16.mxu0 %v4885_v22  ;;  %v4973_v19 = vld [vmem:[%s5501_s4 + $0x150] ss:$12 sps:$4 sm:$0xff]   ;;  %v4978_v22 = vld [vmem:[%s5501_s4 + $0x5ec] ss:$12 sps:$4 sm:$0xff]  }
  0xb3   : > { %2123 = vmatprep.mubr.bf16.mxu1 %v4887_v23  ;;  %4611 = vmatprep.subr.bf16.mxu1 %v4897_v24  ;;  %v4980_v23 = vld [vmem:[%s5501_s4 + $0x168] ss:$12 sps:$4 sm:$0xff]  }
  0xb6   : > { %4612 = vmatpush3.bf16.msra.mxu1 %v4897_v24  ;;  %v4981_v24 = vld [vmem:[%s5501_s4 + $0x5e8] ss:$12 sps:$4 sm:$0xff]  }
  0xb7   : > { %4613 = vmatprep.subr.bf16.mxu1 %v4910_v25 }
  0xb9   : > { %1740 = vmatmul.mubr.bf16.gmra.mrb[4].mxu0 %v4889_v26  ;;  %2124 = vmatmul.mubr.bf16.gmra.mrb[4].mxu1 %v4890_v27  ;;  %v4984_v26 = vld [vmem:[%s5501_s4 + $0x8] ss:$12 sps:$4 sm:$0xff]   ;;  %v4985_v27 = vld [vmem:[%s5501_s4 + $0x180] ss:$12 sps:$4 sm:$0xff]  }
  0xba   : > { %1747 = vmatprep.mubr.bf16.mxu0 %v4891_v28  ;;  %2131 = vmatprep.mubr.bf16.mxu1 %v4893_v29  ;;  %v4986_v28 = vld [vmem:[%s5501_s4 + $0x20] ss:$12 sps:$4 sm:$0xff]   ;;  %v4987_v29 = vld [vmem:[%s5501_s4 + $0x19c] ss:$12 sps:$4 sm:$0xff]  }
  0xbb   : > { %4614 = vmatpush3.bf16.msra.mxu1 %v4910_v25  ;;  %v4982_v25 = vld [vmem:[%s5501_s4 + $0x184] ss:$12 sps:$4 sm:$0xff]  }
  0xbc   : > { %4615 = vmatprep.subr.bf16.mxu1 %v4923_v30 }
  0xbf   : > { %4616 = vmatpush3.bf16.msra.mxu1 %v4923_v30  ;;  %v4989_v30 = vld [vmem:[%s5501_s4 + $0x38] ss:$12 sps:$4 sm:$0xff]  }
  0xc0   : > { %4617 = vmatprep.subr.bf16.mxu1 %v4936_v33 }
  0xc1   : > { %1748 = vmatmul.mubr.bf16.gmra.mrb[8].mxu0 %v4895_v31  ;;  %2132 = vmatmul.mubr.bf16.gmra.mrb[8].mxu1 %v4896_v32  ;;  %v4990_v31 = vld [vmem:[%s5501_s4 + $0x198] ss:$12 sps:$4 sm:$0xff]   ;;  %v4991_v32 = vld [vmem:[%s5501_s4 + $0x50] ss:$12 sps:$4 sm:$0xff]  }
  0xc2   : > { %1755 = vmatprep.mubr.bf16.mxu0 %v4898_v34  ;;  %2139 = vmatprep.mubr.bf16.mxu1 %v4900_v35  ;;  %v4994_v34 = vld [vmem:[%s5501_s4 + $0x68] ss:$12 sps:$4 sm:$0xff]   ;;  %v4995_v35 = vld [vmem:[%s5501_s4 + $0x1b0] ss:$12 sps:$4 sm:$0xff]  }
  0xc3   : > { %4618 = vmatpush3.bf16.msra.mxu1 %v4936_v33  ;;  %v4992_v33 = vld [vmem:[%s5501_s4 + $0x1b4] ss:$12 sps:$4 sm:$0xff]  }
  0xc4   : > { %4619 = vmatprep.subr.bf16.mxu1 %v4949_v36 }
  0xc7   : > { %4620 = vmatpush3.bf16.msra.mxu1 %v4949_v36  ;;  %v4996_v36 = vld [vmem:[%s5501_s4 + $0x80] ss:$12 sps:$4 sm:$0xff]  }
  0xc8   : > { %4621 = vmatprep.subr.bf16.mxu1 %v4962_v37 }
  0xc9   : > { %1756 = vmatmul.mubr.bf16.gmra.mrb[12].mxu0 %v4902_v38  ;;  %2140 = vmatmul.mubr.bf16.gmra.mrb[12].mxu1 %v4903_v39  ;;  %v4999_v38 = vld [vmem:[%s5501_s4 + $0x98] ss:$12 sps:$4 sm:$0xff]   ;;  %v5000_v39 = vld [vmem:[%s5501_s4 + $0x1c8] ss:$12 sps:$4 sm:$0xff]  }
  0xca   : > { %1763 = vmatprep.mubr.bf16.mxu0 %v4904_v40  ;;  %2147 = vmatprep.mubr.bf16.mxu1 %v4906_v41  ;;  %v5001_v40 = vld [vmem:[%s5501_s4 + $0xb0] ss:$12 sps:$4 sm:$0xff]  }
  0xcb   : > { %4622 = vmatpush3.bf16.msra.mxu1 %v4962_v37  ;;  %v4997_v37 = vld [vmem:[%s5501_s4 + $0x1cc] ss:$12 sps:$4 sm:$0xff]   ;;  %v5002_v41 = vld [vmem:[%s5501_s4 + $0x1e4] ss:$12 sps:$4 sm:$0xff]  }
  0xcc   : > { %4623 = vmatprep.subr.bf16.mxu1 %v4975_v42 }
  0xcf   : > { %4624 = vmatpush3.bf16.msra.mxu1 %v4975_v42  ;;  %v5004_v42 = vld [vmem:[%s5501_s4 + $0xc8] ss:$12 sps:$4 sm:$0xff]  }
  0xd1   : > { %1764 = vmatmul.mubr.bf16.gmra.mrb[16].mxu0 %v4908_v43  ;;  %2148 = vmatmul.mubr.bf16.gmra.mrb[16].mxu1 %v4909_v44  ;;  %v5005_v43 = vld [vmem:[%s5501_s4 + $0x1e0] ss:$12 sps:$4 sm:$0xff]  }
  0xd2   : > { %1771 = vmatprep.mubr.bf16.mxu0 %v4911_v45  ;;  %2155 = vmatprep.mubr.bf16.mxu1 %v4913_v46  ;;  %v5006_v44 = vld [vmem:[%s5501_s4 + $0xe0] ss:$12 sps:$4 sm:$0xff]   ;;  %v5007_v45 = vld [vmem:[%s5501_s4 + $0x1fc] ss:$12 sps:$4 sm:$0xff]   ;;  %v5009_v46 = vld [vmem:[%s5501_s4 + $0xf8] ss:$12 sps:$4 sm:$0xff]  }
  0xd9   : > { %1772 = vmatmul.mubr.bf16.gmra.mrb[20].mxu0 %v4915_v47  ;;  %2156 = vmatmul.mubr.bf16.gmra.mrb[20].mxu1 %v4916_v48  ;;  %v5010_v47 = vld [vmem:[%s5501_s4 + $0x1f8] ss:$12 sps:$4 sm:$0xff]   ;;  %v5011_v48 = vld [vmem:[%s5501_s4 + $0x110] ss:$12 sps:$4 sm:$0xff]  }
  0xda   : > { %1779 = vmatprep.mubr.bf16.mxu0 %v4917_v49  ;;  %2163 = vmatprep.mubr.bf16.mxu1 %v4919_v50  ;;  %v5012_v49 = vld [vmem:[%s5501_s4 + $0x214] ss:$12 sps:$4 sm:$0xff]  }
  0xdb   : > { %v5014_v50 = vld [vmem:[%s5501_s4 + $0x128] ss:$12 sps:$4 sm:$0xff]  }
  0xe1   : > { %1780 = vmatmul.mubr.bf16.gmra.mrb[24].mxu0 %v4921_v51  ;;  %2164 = vmatmul.mubr.bf16.gmra.mrb[24].mxu1 %v4922_v52  ;;  %v5015_v51 = vld [vmem:[%s5501_s4 + $0x210] ss:$12 sps:$4 sm:$0xff]   ;;  %v5016_v52 = vld [vmem:[%s5501_s4 + $0x140] ss:$12 sps:$4 sm:$0xff]  }
  0xe2   : > { %1787 = vmatprep.mubr.bf16.mxu0 %v4924_v53  ;;  %2171 = vmatprep.mubr.bf16.mxu1 %v4926_v54  ;;  %v5017_v53 = vld [vmem:[%s5501_s4 + $0x22c] ss:$12 sps:$4 sm:$0xff]  }
  0xe3   : > { %v5019_v54 = vld [vmem:[%s5501_s4 + $0x158] ss:$12 sps:$4 sm:$0xff]  }
  0xe9   : > { %1788 = vmatmul.mubr.bf16.gmra.mrb[28].mxu0 %v4928_v55  ;;  %2172 = vmatmul.mubr.bf16.gmra.mrb[28].mxu1 %v4929_v56  ;;  %v5020_v55 = vld [vmem:[%s5501_s4 + $0x228] ss:$12 sps:$4 sm:$0xff]   ;;  %v5021_v56 = vld [vmem:[%s5501_s4 + $0x170] ss:$12 sps:$4 sm:$0xff]  }
  0xea   : > { %1795 = vmatprep.mubr.bf16.mxu0 %v4930_v57  ;;  %2179 = vmatprep.mubr.bf16.mxu1 %v4932_v58  ;;  %v5022_v57 = vld [vmem:[%s5501_s4 + $0x244] ss:$12 sps:$4 sm:$0xff]   ;;  %v5024_v58 = vld [vmem:[%s5501_s4 + $0x188] ss:$12 sps:$4 sm:$0xff]  }
  0xf1   : > { %1796 = vmatmul.mubr.bf16.gmra.mrb[32].mxu0 %v4934_v59  ;;  %2180 = vmatmul.mubr.bf16.gmra.mrb[32].mxu1 %v4935_v60  ;;  %v5025_v59 = vld [vmem:[%s5501_s4 + $0x240] ss:$12 sps:$4 sm:$0xff]  }
  0xf2   : > { %1803 = vmatprep.mubr.bf16.mxu0 %v4937_v61  ;;  %2187 = vmatprep.mubr.bf16.mxu1 %v4939_v62  ;;  %v5026_v60 = vld [vmem:[%s5501_s4 + $0x1a0] ss:$12 sps:$4 sm:$0xff]   ;;  %v5027_v61 = vld [vmem:[%s5501_s4 + $0x25c] ss:$12 sps:$4 sm:$0xff]   ;;  %v5029_v62 = vld [vmem:[%s5501_s4 + $0x1b8] ss:$12 sps:$4 sm:$0xff]  }
  0xf9   : > { %1804 = vmatmul.mubr.bf16.gmra.mrb[36].mxu0 %v4941_v63  ;;  %2188 = vmatmul.mubr.bf16.gmra.mrb[36].mxu1 %v4942_v0  ;;  %v5030_v63 = vld [vmem:[%s5501_s4 + $0x258] ss:$12 sps:$4 sm:$0xff]   ;;  %v5031_v0 = vld [vmem:[%s5501_s4 + $0x1d0] ss:$12 sps:$4 sm:$0xff]  }
  0xfa   : > { %1811 = vmatprep.mubr.bf16.mxu0 %v4943_v1  ;;  %2195 = vmatprep.mubr.bf16.mxu1 %v4945_v2  ;;  %v5032_v1 = vld [vmem:[%s5501_s4 + $0x274] ss:$12 sps:$4 sm:$0xff]  }
  0xfb   : > { %v5034_v2 = vld [vmem:[%s5501_s4 + $0x1e8] ss:$12 sps:$4 sm:$0xff]  }
 0x101   : > { %1812 = vmatmul.mubr.bf16.gmra.mrb[40].mxu0 %v4947_v3  ;;  %2196 = vmatmul.mubr.bf16.gmra.mrb[40].mxu1 %v4948_v4  ;;  %v5035_v3 = vld [vmem:[%s5501_s4 + $0x270] ss:$12 sps:$4 sm:$0xff]   ;;  %v5036_v4 = vld [vmem:[%s5501_s4 + $0x200] ss:$12 sps:$4 sm:$0xff]  }
 0x102   : > { %1819 = vmatprep.mubr.bf16.mxu0 %v4950_v5  ;;  %2203 = vmatprep.mubr.bf16.mxu1 %v4952_v6  ;;  %v5037_v5 = vld [vmem:[%s5501_s4 + $0x28c] ss:$12 sps:$4 sm:$0xff]  }
 0x103   : > { %v5039_v6 = vld [vmem:[%s5501_s4 + $0x218] ss:$12 sps:$4 sm:$0xff]  }
 0x109   : > { %1820 = vmatmul.mubr.bf16.gmra.mrb[44].mxu0 %v4954_v7  ;;  %2204 = vmatmul.mubr.bf16.gmra.mrb[44].mxu1 %v4955_v8 }
 0x10a   : > { %1827 = vmatprep.mubr.bf16.mxu0 %v4956_v9  ;;  %2211 = vmatprep.mubr.bf16.mxu1 %v4958_v10 }
 0x111   : > { %1828 = vmatmul.mubr.bf16.gmra.mrb[48].mxu0 %v4960_v11  ;;  %2212 = vmatmul.mubr.bf16.gmra.mrb[48].mxu1 %v4961_v12  ;;  %v5040_v11 = vld [vmem:[%s5501_s4 + $0x288] ss:$12 sps:$4 sm:$0xff]   ;;  %v5041_v12 = vld [vmem:[%s5501_s4 + $0x230] ss:$12 sps:$4 sm:$0xff]  }
 0x112   : > { %1835 = vmatprep.mubr.bf16.mxu0 %v4963_v13  ;;  %2219 = vmatprep.mubr.bf16.mxu1 %v4965_v14 }
 0x119   : > { %1836 = vmatmul.mubr.bf16.gmra.mrb[52].mxu0 %v4967_v15  ;;  %2220 = vmatmul.mubr.bf16.gmra.mrb[52].mxu1 %v4968_v16  ;;  %v5042_v15 = vld [vmem:[%s5501_s4 + $0x2a4] ss:$12 sps:$4 sm:$0xff]   ;;  %v5044_v16 = vld [vmem:[%s5501_s4 + $0x248] ss:$12 sps:$4 sm:$0xff]  }
 0x11a   : > { %1843 = vmatprep.mubr.bf16.mxu0 %v4969_v17  ;;  %2227 = vmatprep.mubr.bf16.mxu1 %v4971_v18 }
 0x121   : > { %1844 = vmatmul.mubr.bf16.gmra.mrb[56].mxu0 %v4973_v19  ;;  %2228 = vmatmul.mubr.bf16.gmra.mrb[56].mxu1 %v4974_v20 }
 0x122   : > { %1851 = vmatprep.mubr.bf16.mxu0 %v4976_v21  ;;  %2235 = vmatprep.mubr.bf16.mxu1 %v4978_v22 }
 0x129   : > { %1852 = vmatmul.mubr.bf16.gmra.mrb[60].mxu0 %v4980_v23  ;;  %2236 = vmatmul.mubr.bf16.gmra.mrb[60].mxu1 %v4981_v24  ;;  %v5045_v23 = vld [vmem:[%s5501_s4 + $0x2a0] ss:$12 sps:$4 sm:$0xff]  }
 0x12a   : > { %1859 = vmatprep.mubr.bf16.mxu0 %v4982_v25  ;;  %4625 = vmatprep.mubr.bf16.mxu1 %v4984_v26  ;;  %v5046_v24 = vld [vmem:[%s5501_s4 + $0x260] ss:$12 sps:$4 sm:$0xff]  }
 0x131   : > { %1860 = vmatmul.mubr.bf16.gmra.mrb[64].mxu0 %v4985_v27  ;;  %4626 = vmatmul.mubr.bf16.vlgmr.msra.gmra.mrb[64].mxu1 %v4986_v28  ;;  %v5047_v27 = vld [vmem:[%s5501_s4 + $0x2bc] ss:$12 sps:$4 sm:$0xff]   ;;  %v5049_v28 = vld [vmem:[%s5501_s4 + $0x278] ss:$12 sps:$4 sm:$0xff]  }
 0x132   : > { %1867 = vmatprep.mubr.bf16.mxu0 %v4987_v29  ;;  %4629 = vmatprep.mubr.bf16.mxu1 %v4989_v30 }
 0x139   : > { %1868 = vmatmul.mubr.bf16.gmra.mrb[68].mxu0 %v4990_v31  ;;  %4630 = vmatmul.mubr.bf16.gmra.mrb[68].mxu1 %v4991_v32 }
 0x13a   : > { %1875 = vmatprep.mubr.bf16.mxu0 %v4992_v33  ;;  %4633 = vmatprep.mubr.bf16.mxu1 %v4994_v34 }
 0x141   : > { %1876 = vmatmul.mubr.bf16.gmra.mrb[72].mxu0 %v4995_v35  ;;  %4634 = vmatmul.mubr.bf16.gmra.mrb[72].mxu1 %v4996_v36  ;;  %v5050_v35 = vld [vmem:[%s5501_s4 + $0x2b8] ss:$12 sps:$4 sm:$0xff]   ;;  %v5051_v36 = vld [vmem:[%s5501_s4 + $0x290] ss:$12 sps:$4 sm:$0xff]  }
 0x142   : > { %1883 = vmatprep.mubr.bf16.mxu0 %v4997_v37  ;;  %4637 = vmatprep.mubr.bf16.mxu1 %v4999_v38 }
 0x149   : > { %1884 = vmatmul.mubr.bf16.gmra.mrb[76].mxu0 %v5000_v39  ;;  %4638 = vmatmul.mubr.bf16.gmra.mrb[76].mxu1 %v5001_v40  ;;  %v5052_v39 = vld [vmem:[%s5501_s4 + $0x2d4] ss:$12 sps:$4 sm:$0xff]  }
 0x14a   : > { %1891 = vmatprep.mubr.bf16.mxu0 %v5002_v41  ;;  %4641 = vmatprep.mubr.bf16.mxu1 %v5004_v42  ;;  %v5054_v40 = vld [vmem:[%s5501_s4 + $0x2a8] ss:$12 sps:$4 sm:$0xff]  }
 0x151   : > { %1892 = vmatmul.mubr.bf16.gmra.mrb[80].mxu0 %v5005_v43  ;;  %4642 = vmatmul.mubr.bf16.gmra.mrb[80].mxu1 %v5006_v44 }
 0x152   : > { %1899 = vmatprep.mubr.bf16.mxu0 %v5007_v45  ;;  %4645 = vmatprep.mubr.bf16.mxu1 %v5009_v46 }
 0x159   : > { %1900 = vmatmul.mubr.bf16.gmra.mrb[84].mxu0 %v5010_v47  ;;  %4646 = vmatmul.mubr.bf16.gmra.mrb[84].mxu1 %v5011_v48  ;;  %v5055_v47 = vld [vmem:[%s5501_s4 + $0x2d0] ss:$12 sps:$4 sm:$0xff]   ;;  %v5056_v48 = vld [vmem:[%s5501_s4 + $0x2c0] ss:$12 sps:$4 sm:$0xff]  }
 0x15a   : > { %1907 = vmatprep.mubr.bf16.mxu0 %v5012_v49  ;;  %4649 = vmatprep.mubr.bf16.mxu1 %v5014_v50 }
 0x161   : > { %1908 = vmatmul.mubr.bf16.gmra.mrb[88].mxu0 %v5015_v51  ;;  %4650 = vmatmul.mubr.bf16.gmra.mrb[88].mxu1 %v5016_v52  ;;  %v5057_v51 = vld [vmem:[%s5501_s4 + $0x2ec] ss:$12 sps:$4 sm:$0xff]  }
 0x162   : > { %1915 = vmatprep.mubr.bf16.mxu0 %v5017_v53  ;;  %4653 = vmatprep.mubr.bf16.mxu1 %v5019_v54  ;;  %v5059_v52 = vld [vmem:[%s5501_s4 + $0x2d8] ss:$12 sps:$4 sm:$0xff]  }
 0x169   : > { %1916 = vmatmul.mubr.bf16.gmra.mrb[92].mxu0 %v5020_v55  ;;  %4654 = vmatmul.mubr.bf16.gmra.mrb[92].mxu1 %v5021_v56 }
 0x16a   : > { %1923 = vmatprep.mubr.bf16.mxu0 %v5022_v57  ;;  %4657 = vmatprep.mubr.bf16.mxu1 %v5024_v58 }
 0x171   : > { %1924 = vmatmul.mubr.bf16.gmra.mrb[96].mxu0 %v5025_v59  ;;  %4658 = vmatmul.mubr.bf16.gmra.mrb[96].mxu1 %v5026_v60  ;;  %v5060_v59 = vld [vmem:[%s5501_s4 + $0x2e8] ss:$12 sps:$4 sm:$0xff]   ;;  %v5061_v60 = vld [vmem:[%s5501_s4 + $0x2f0] ss:$12 sps:$4 sm:$0xff]  }
 0x172   : > { %1931 = vmatprep.mubr.bf16.mxu0 %v5027_v61  ;;  %4661 = vmatprep.mubr.bf16.mxu1 %v5029_v62 }
 0x179   : > { %1932 = vmatmul.mubr.bf16.gmra.mrb[100].mxu0 %v5030_v63  ;;  %4662 = vmatmul.mubr.bf16.gmra.mrb[100].mxu1 %v5031_v0  ;;  %v5062_v63 = vld [vmem:[%s5501_s4 + $0x304] ss:$12 sps:$4 sm:$0xff]   ;;  %v5064_v0 = vld [vmem:[%s5501_s4 + $0x308] ss:$12 sps:$4 sm:$0xff]  }
 0x17a   : > { %1939 = vmatprep.mubr.bf16.mxu0 %v5032_v1  ;;  %4665 = vmatprep.mubr.bf16.mxu1 %v5034_v2 }
 0x181   : > { %1940 = vmatmul.mubr.bf16.gmra.mrb[104].mxu0 %v5035_v3  ;;  %4666 = vmatmul.mubr.bf16.gmra.mrb[104].mxu1 %v5036_v4 }
 0x182   : > { %1947 = vmatprep.mubr.bf16.mxu0 %v5037_v5  ;;  %4669 = vmatprep.mubr.bf16.mxu1 %v5039_v6 }
 0x184   : > { %v5653_v7 = vpop.f32.mrb[0].mxu0  ;;  %v5655_v8 = vpop.f32.mrb[0].mxu1 }
 0x185   : > { %v1735_v9 = vpop.f32.mrb[1].mxu0  ;;  %v2119_v10 = vpop.f32.mrb[1].mxu1 }
 0x186   : > { %v5659_v13 = vpop.f32.mrb[2].mxu0  ;;  %v5661_v14 = vpop.f32.mrb[2].mxu1  ;;  %v5065_v9 = vld [vmem:[%s5501_s4 + $0x300] ss:$12 sps:$4 sm:$0xff]  }
 0x187   : > { %v1738_v17 = vpop.f32.mrb[3].mxu0  ;;  %v2122_v18 = vpop.f32.mrb[3].mxu1  ;;  %v5066_v10 = vld [vmem:[%s5501_s4 + $0x320] ss:$12 sps:$4 sm:$0xff]  }
 0x189   : > { %1948 = vmatmul.mubr.bf16.gmra.mrb[108].mxu0 %v5040_v11  ;;  %4670 = vmatmul.mubr.bf16.gmra.mrb[108].mxu1 %v5041_v12 }
 0x18a   : > { %1955 = vmatprep.mubr.bf16.mxu0 %v5042_v15  ;;  %4673 = vmatprep.mubr.bf16.mxu1 %v5044_v16  ;;  %v5067_v15 = vld [vmem:[%s5501_s4 + $0x31c] ss:$12 sps:$4 sm:$0xff]   ;;  %v5069_v16 = vld [vmem:[%s5501_s4 + $0x338] ss:$12 sps:$4 sm:$0xff]  }
 0x18c   : > { %v5665_v19 = vpop.f32.mrb[4].mxu0  ;;  %v5667_v20 = vpop.f32.mrb[4].mxu1 }
 0x18d   : > { %v1743_v21 = vpop.f32.mrb[5].mxu0  ;;  %v2127_v22 = vpop.f32.mrb[5].mxu1 }
 0x18e   : > { %v5671_v25 = vpop.f32.mrb[6].mxu0  ;;  %v5673_v26 = vpop.f32.mrb[6].mxu1 }
 0x18f   : > { %v1746_v29 = vpop.f32.mrb[7].mxu0  ;;  %v2130_v30 = vpop.f32.mrb[7].mxu1 }
 0x191   : > { %1956 = vmatmul.mubr.bf16.gmra.mrb[112].mxu0 %v5045_v23  ;;  %4674 = vmatmul.mubr.bf16.gmra.mrb[112].mxu1 %v5046_v24 }
 0x192   : > { %1963 = vmatprep.mubr.bf16.mxu0 %v5047_v27  ;;  %4677 = vmatprep.mubr.bf16.mxu1 %v5049_v28  ;;  %v5070_v27 = vld [vmem:[%s5501_s4 + $0x318] ss:$12 sps:$4 sm:$0xff]   ;;  %v5071_v28 = vld [vmem:[%s5501_s4 + $0x350] ss:$12 sps:$4 sm:$0xff]  }
 0x194   : > { %v5677_v31 = vpop.f32.mrb[8].mxu0  ;;  %v5679_v32 = vpop.f32.mrb[8].mxu1 }
 0x195   : > { %v1751_v33 = vpop.f32.mrb[9].mxu0  ;;  %v2135_v34 = vpop.f32.mrb[9].mxu1 }
 0x196   : > { %v5683_v37 = vpop.f32.mrb[10].mxu0  ;;  %v5685_v38 = vpop.f32.mrb[10].mxu1  ;;  %v5072_v33 = vld [vmem:[%s5501_s4 + $0x334] ss:$12 sps:$4 sm:$0xff]  }
 0x197   : > { %v1754_v41 = vpop.f32.mrb[11].mxu0  ;;  %v2138_v42 = vpop.f32.mrb[11].mxu1  ;;  %v5074_v34 = vld [vmem:[%s5501_s4 + $0x368] ss:$12 sps:$4 sm:$0xff]  }
 0x199   : > { %1964 = vmatmul.mubr.bf16.gmra.mrb[116].mxu0 %v5050_v35  ;;  %4678 = vmatmul.mubr.bf16.gmra.mrb[116].mxu1 %v5051_v36 }
 0x19a   : > { %1971 = vmatprep.mubr.bf16.mxu0 %v5052_v39  ;;  %4681 = vmatprep.mubr.bf16.mxu1 %v5054_v40 }
 0x19c   : > { %v5689_v43 = vpop.f32.mrb[12].mxu0  ;;  %v5691_v44 = vpop.f32.mrb[12].mxu1 }
 0x19d   : > { %v1759_v45 = vpop.f32.mrb[13].mxu0  ;;  %v2143_v46 = vpop.f32.mrb[13].mxu1 }
 0x19e   : > { %v5695_v49 = vpop.f32.mrb[14].mxu0  ;;  %v5697_v50 = vpop.f32.mrb[14].mxu1  ;;  %v5075_v45 = vld [vmem:[%s5501_s4 + $0x330] ss:$12 sps:$4 sm:$0xff]   ;;  %v5076_v46 = vld [vmem:[%s5501_s4 + $0x380] ss:$12 sps:$4 sm:$0xff]  }
 0x19f   : > { %v1762_v53 = vpop.f32.mrb[15].mxu0  ;;  %v2146_v54 = vpop.f32.mrb[15].mxu1 }
 0x1a1   : > { %1972 = vmatmul.mubr.bf16.gmra.mrb[120].mxu0 %v5055_v47  ;;  %4682 = vmatmul.mubr.bf16.gmra.mrb[120].mxu1 %v5056_v48 }
 0x1a2   : > { %1979 = vmatprep.mubr.bf16.mxu0 %v5057_v51  ;;  %4685 = vmatprep.mubr.bf16.mxu1 %v5059_v52  ;;  %v5077_v51 = vld [vmem:[%s5501_s4 + $0x34c] ss:$12 sps:$4 sm:$0xff]  }
 0x1a3   : > { %v5079_v52 = vld [vmem:[%s5501_s4 + $0x398] ss:$12 sps:$4 sm:$0xff]  }
 0x1a4   : > { %v5701_v55 = vpop.f32.mrb[16].mxu0  ;;  %v5703_v56 = vpop.f32.mrb[16].mxu1 }
 0x1a5   : > { %v1767_v57 = vpop.f32.mrb[17].mxu0  ;;  %v2151_v58 = vpop.f32.mrb[17].mxu1 }
 0x1a6   : > { %v5707_v61 = vpop.f32.mrb[18].mxu0  ;;  %v5709_v62 = vpop.f32.mrb[18].mxu1 }
 0x1a7   : > { %v1770_v1 = vpop.f32.mrb[19].mxu0  ;;  %v2154_v2 = vpop.f32.mrb[19].mxu1 }
 0x1a9   : > { %1980 = vmatmul.mubr.bf16.gmra.mrb[124].mxu0 %v5060_v59  ;;  %4686 = vmatmul.mubr.bf16.gmra.mrb[124].mxu1 %v5061_v60 }
 0x1aa   : > { %1987 = vmatprep.mubr.bf16.mxu0 %v5062_v63  ;;  %4689 = vmatprep.mubr.bf16.mxu1 %v5064_v0  ;;  %v5080_v63 = vld [vmem:[%s5501_s4 + $0x348] ss:$12 sps:$4 sm:$0xff]   ;;  %v5081_v0 = vld [vmem:[%s5501_s4 + $0x3b0] ss:$12 sps:$4 sm:$0xff]  }
 0x1ac   : > { %v5713_v3 = vpop.f32.mrb[20].mxu0  ;;  %v5715_v4 = vpop.f32.mrb[20].mxu1 }
 0x1ad   : > { %v1775_v5 = vpop.f32.mrb[21].mxu0  ;;  %v2159_v6 = vpop.f32.mrb[21].mxu1 }
 0x1ae   : > { %v5719_v11 = vpop.f32.mrb[22].mxu0  ;;  %v5721_v12 = vpop.f32.mrb[22].mxu1  ;;  %v5082_v5 = vld [vmem:[%s5501_s4 + $0x364] ss:$12 sps:$4 sm:$0xff]   ;;  %v5084_v6 = vld [vmem:[%s5501_s4 + $0x3c8] ss:$12 sps:$4 sm:$0xff]  }
 0x1af   : > { %v1778_v17 = vpop.f32.mrb[23].mxu0  ;;  %v2162_v18 = vpop.f32.mrb[23].mxu1 }
 0x1b1   : > { %1988 = vmatmul.mubr.bf16.gmra.mrb[128].mxu0 %v5065_v9  ;;  %4690 = vmatmul.mubr.bf16.gmra.mrb[128].mxu1 %v5066_v10 }
 0x1b2   : > { %1995 = vmatprep.mubr.bf16.mxu0 %v5067_v15  ;;  %4693 = vmatprep.mubr.bf16.mxu1 %v5069_v16 }
 0x1b4   : > { %v5725_v21 = vpop.f32.mrb[24].mxu0  ;;  %v5727_v22 = vpop.f32.mrb[24].mxu1 }
 0x1b5   : > { %6314 = vst [vmem:[#allocation12_spill] sm:$0xff] %v5727_v22  ;;  %v1783_v23 = vpop.f32.mrb[25].mxu0  ;;  %v2167_v24 = vpop.f32.mrb[25].mxu1 }
 0x1b6   : > { %v5731_v29 = vpop.f32.mrb[26].mxu0  ;;  %v5733_v30 = vpop.f32.mrb[26].mxu1  ;;  %v5085_v23 = vld [vmem:[%s5501_s4 + $0x360] ss:$12 sps:$4 sm:$0xff]  }
 0x1b7   : > { %6315 = vst [vmem:[#allocation13_spill] sm:$0xff] %v5733_v30  ;;  %v1786_v35 = vpop.f32.mrb[27].mxu0  ;;  %v2170_v36 = vpop.f32.mrb[27].mxu1  ;;  %v5086_v24 = vld [vmem:[%s5501_s4 + $0x3e0] ss:$12 sps:$4 sm:$0xff]  }
 0x1b9   : > { %1996 = vmatmul.mubr.bf16.gmra.mrb[132].mxu0 %v5070_v27  ;;  %4694 = vmatmul.mubr.bf16.gmra.mrb[132].mxu1 %v5071_v28 }
 0x1ba   : > { %2003 = vmatprep.mubr.bf16.mxu0 %v5072_v33  ;;  %4697 = vmatprep.mubr.bf16.mxu1 %v5074_v34  ;;  %v5087_v33 = vld [vmem:[%s5501_s4 + $0x37c] ss:$12 sps:$4 sm:$0xff]   ;;  %v5089_v34 = vld [vmem:[%s5501_s4 + $0x3f8] ss:$12 sps:$4 sm:$0xff]  }
 0x1bc   : > { %v5737_v39 = vpop.f32.mrb[28].mxu0  ;;  %v5739_v40 = vpop.f32.mrb[28].mxu1 }
 0x1bd   : > { %v1791_v41 = vpop.f32.mrb[29].mxu0  ;;  %v2175_v42 = vpop.f32.mrb[29].mxu1 }
 0x1be   : > { %v5743_v47 = vpop.f32.mrb[30].mxu0  ;;  %v5745_v48 = vpop.f32.mrb[30].mxu1 }
 0x1bf   : > { %6316 = vst [vmem:[#allocation14_spill] sm:$0xff] %v5745_v48  ;;  %v1794_v53 = vpop.f32.mrb[31].mxu0  ;;  %v2178_v54 = vpop.f32.mrb[31].mxu1 }
 0x1c1   : > { %2004 = vmatmul.mubr.bf16.gmra.mrb[136].mxu0 %v5075_v45  ;;  %4698 = vmatmul.mubr.bf16.gmra.mrb[136].mxu1 %v5076_v46 }
 0x1c2   : > { %2011 = vmatprep.mubr.bf16.mxu0 %v5077_v51  ;;  %4701 = vmatprep.mubr.bf16.mxu1 %v5079_v52  ;;  %v5090_v51 = vld [vmem:[%s5501_s4 + $0x378] ss:$12 sps:$4 sm:$0xff]   ;;  %v5091_v52 = vld [vmem:[%s5501_s4 + $0x410] ss:$12 sps:$4 sm:$0xff]  }
 0x1c4   : > { %v5749_v57 = vpop.f32.mrb[32].mxu0  ;;  %v5751_v58 = vpop.f32.mrb[32].mxu1 }
 0x1c5   : > { %6317 = vst [vmem:[#allocation15_spill] sm:$0xff] %v5751_v58  ;;  %v1799_v59 = vpop.f32.mrb[33].mxu0  ;;  %v2183_v60 = vpop.f32.mrb[33].mxu1  ;;  %v5122_v58 = vld [vmem:[%s5501_s4 + $0x424] ss:$12 sps:$4 sm:$0xff]  }
 0x1c6   : > { %v5755_v1 = vpop.f32.mrb[34].mxu0  ;;  %v5757_v2 = vpop.f32.mrb[34].mxu1  ;;  %v5092_v59 = vld [vmem:[%s5501_s4 + $0x394] ss:$12 sps:$4 sm:$0xff]  }
 0x1c7   : > { %6318 = vst [vmem:[#allocation16_spill] sm:$0xff] %v5757_v2  ;;  %v1802_v9 = vpop.f32.mrb[35].mxu0  ;;  %v2186_v10 = vpop.f32.mrb[35].mxu1  ;;  %v5094_v60 = vld [vmem:[%s5501_s4 + $0x428] ss:$12 sps:$4 sm:$0xff]  }
 0x1c8   : > { %v5117_v2 = vld [vmem:[%s5501_s4 + $0x40c] ss:$12 sps:$4 sm:$0xff]  }
 0x1c9   : > { %2012 = vmatmul.mubr.bf16.gmra.mrb[140].mxu0 %v5080_v63  ;;  %4702 = vmatmul.mubr.bf16.gmra.mrb[140].mxu1 %v5081_v0 }
 0x1ca   : > { %2019 = vmatprep.mubr.bf16.mxu0 %v5082_v5  ;;  %4705 = vmatprep.mubr.bf16.mxu1 %v5084_v6 }
 0x1cc   : > { %v5761_v15 = vpop.f32.mrb[36].mxu0  ;;  %v5763_v16 = vpop.f32.mrb[36].mxu1 }
 0x1cd   : > { %6319 = vst [vmem:[#allocation17_spill] sm:$0xff] %v5763_v16  ;;  %v1807_v17 = vpop.f32.mrb[37].mxu0  ;;  %v2191_v18 = vpop.f32.mrb[37].mxu1 }
 0x1ce   : > { %v5767_v27 = vpop.f32.mrb[38].mxu0  ;;  %v5769_v28 = vpop.f32.mrb[38].mxu1  ;;  %v5095_v17 = vld [vmem:[%s5501_s4 + $0x390] ss:$12 sps:$4 sm:$0xff]   ;;  %v5096_v18 = vld [vmem:[%s5501_s4 + $0x440] ss:$12 sps:$4 sm:$0xff]  }
 0x1cf   : > { %6320 = vst [vmem:[#allocation18_spill] sm:$0xff] %v5769_v28  ;;  %v1810_v35 = vpop.f32.mrb[39].mxu0  ;;  %v2194_v36 = vpop.f32.mrb[39].mxu1  ;;  %v5119_v28 = vld [vmem:[%s5501_s4 + $0x518] ss:$12 sps:$4 sm:$0xff]  }
 0x1d1   : > { %2020 = vmatmul.mubr.bf16.gmra.mrb[144].mxu0 %v5085_v23  ;;  %4706 = vmatmul.mubr.bf16.gmra.mrb[144].mxu1 %v5086_v24 }
 0x1d2   : > { %2027 = vmatprep.mubr.bf16.mxu0 %v5087_v33  ;;  %4709 = vmatprep.mubr.bf16.mxu1 %v5089_v34  ;;  %v5097_v33 = vld [vmem:[%s5501_s4 + $0x3ac] ss:$12 sps:$4 sm:$0xff]  }
 0x1d3   : > { %v5099_v34 = vld [vmem:[%s5501_s4 + $0x458] ss:$12 sps:$4 sm:$0xff]  }
 0x1d4   : > { %v5773_v41 = vpop.f32.mrb[40].mxu0  ;;  %v5775_v42 = vpop.f32.mrb[40].mxu1 }
 0x1d5   : > { %6321 = vst [vmem:[#allocation19_spill] sm:$0xff] %v5775_v42  ;;  %v1815_v45 = vpop.f32.mrb[41].mxu0  ;;  %v2199_v46 = vpop.f32.mrb[41].mxu1  ;;  %v5116_v42 = vld [vmem:[%s5501_s4 + $0x500] ss:$12 sps:$4 sm:$0xff]  }
 0x1d6   : > { %v5779_v53 = vpop.f32.mrb[42].mxu0  ;;  %v5781_v54 = vpop.f32.mrb[42].mxu1 }
 0x1d7   : > { %6322 = vst [vmem:[#allocation20_spill] sm:$0xff] %v5781_v54  ;;  %v1818_v63 = vpop.f32.mrb[43].mxu0  ;;  %v2202_v0 = vpop.f32.mrb[43].mxu1  ;;  %v5111_v54 = vld [vmem:[%s5501_s4 + $0x4d0] ss:$12 sps:$4 sm:$0xff]  }
 0x1d9   : > { %2028 = vmatmul.mubr.bf16.gmra.mrb[148].mxu0 %v5090_v51  ;;  %4710 = vmatmul.mubr.bf16.gmra.mrb[148].mxu1 %v5091_v52 }
 0x1da   : > { %2035 = vmatprep.mubr.bf16.mxu0 %v5092_v59  ;;  %4713 = vmatprep.mubr.bf16.mxu1 %v5094_v60  ;;  %v5100_v59 = vld [vmem:[%s5501_s4 + $0x3a8] ss:$12 sps:$4 sm:$0xff]   ;;  %v5101_v60 = vld [vmem:[%s5501_s4 + $0x470] ss:$12 sps:$4 sm:$0xff]  }
 0x1dc   : > { %v5785_v5 = vpop.f32.mrb[44].mxu0  ;;  %v5787_v6 = vpop.f32.mrb[44].mxu1 }
 0x1dd   : > { %6323 = vst [vmem:[#allocation21_spill] sm:$0xff] %v5787_v6  ;;  %v1823_v9 = vpop.f32.mrb[45].mxu0  ;;  %v2207_v10 = vpop.f32.mrb[45].mxu1 }
 0x1de   : > { %v5791_v23 = vpop.f32.mrb[46].mxu0  ;;  %v5793_v24 = vpop.f32.mrb[46].mxu1  ;;  %v5102_v9 = vld [vmem:[%s5501_s4 + $0x3c4] ss:$12 sps:$4 sm:$0xff]   ;;  %v5104_v10 = vld [vmem:[%s5501_s4 + $0x488] ss:$12 sps:$4 sm:$0xff]  }
 0x1df   : > { %6324 = vst [vmem:[#allocation22_spill] sm:$0xff] %v5793_v24  ;;  %v1826_v35 = vpop.f32.mrb[47].mxu0  ;;  %v2210_v36 = vpop.f32.mrb[47].mxu1 }
 0x1e1   : > { %2036 = vmatmul.mubr.bf16.gmra.mrb[152].mxu0 %v5095_v17  ;;  %4714 = vmatmul.mubr.bf16.gmra.mrb[152].mxu1 %v5096_v18 }
 0x1e2   : > { %2043 = vmatprep.mubr.bf16.mxu0 %v5097_v33  ;;  %4717 = vmatprep.mubr.bf16.mxu1 %v5099_v34 }
 0x1e4   : > { %v5797_v45 = vpop.f32.mrb[48].mxu0  ;;  %v5799_v46 = vpop.f32.mrb[48].mxu1 }
 0x1e5   : > { %6325 = vst [vmem:[#allocation23_spill] sm:$0xff] %v5799_v46  ;;  %v1831_v51 = vpop.f32.mrb[49].mxu0  ;;  %v2215_v52 = vpop.f32.mrb[49].mxu1 }
 0x1e6   : > { %v5803_v63 = vpop.f32.mrb[50].mxu0  ;;  %v5805_v0 = vpop.f32.mrb[50].mxu1  ;;  %v5105_v51 = vld [vmem:[%s5501_s4 + $0x3c0] ss:$12 sps:$4 sm:$0xff]  }
 0x1e7   : > { %6326 = vst [vmem:[#allocation24_spill] sm:$0xff] %v5805_v0  ;;  %v1834_v17 = vpop.f32.mrb[51].mxu0  ;;  %v2218_v18 = vpop.f32.mrb[51].mxu1  ;;  %v5106_v52 = vld [vmem:[%s5501_s4 + $0x4a0] ss:$12 sps:$4 sm:$0xff]  }
 0x1e8   : > { %v5107_v17 = vld [vmem:[%s5501_s4 + $0x3dc] ss:$12 sps:$4 sm:$0xff]  }
 0x1e9   : > { %2044 = vmatmul.mubr.bf16.gmra.mrb[156].mxu0 %v5100_v59  ;;  %4718 = vmatmul.mubr.bf16.gmra.mrb[156].mxu1 %v5101_v60  ;;  %v5109_v59 = vld [vmem:[%s5501_s4 + $0x4b8] ss:$12 sps:$4 sm:$0xff]  }
 0x1ea   : > { %2051 = vmatprep.mubr.bf16.mxu0 %v5102_v9  ;;  %4721 = vmatprep.mubr.bf16.mxu1 %v5104_v10 }
 0x1ec   : > { %v5809_v33 = vpop.f32.mrb[52].mxu0  ;;  %v5811_v34 = vpop.f32.mrb[52].mxu1 }
 0x1ed   : > { %6327 = vst [vmem:[#allocation25_spill] sm:$0xff] %v5811_v34  ;;  %v1839_v35 = vpop.f32.mrb[53].mxu0  ;;  %v2223_v36 = vpop.f32.mrb[53].mxu1  ;;  %v5110_v34 = vld [vmem:[%s5501_s4 + $0x3d8] ss:$12 sps:$4 sm:$0xff]  }
 0x1ee   : > { %v5815_v0 = vpop.f32.mrb[54].mxu0  ;;  %v5817_v46 = vpop.f32.mrb[54].mxu1 }
 0x1ef   : > { %6328 = vst [vmem:[#allocation26_spill] sm:$0xff] %v5817_v46  ;;  %v1842_v60 = vpop.f32.mrb[55].mxu0  ;;  %v2226_v9 = vpop.f32.mrb[55].mxu1 }
 0x1f0   : > { %v5112_v60 = vld [vmem:[%s5501_s4 + $0x3f4] ss:$12 sps:$4 sm:$0xff]  }
 0x1f1   : > { %2052 = vmatmul.mubr.bf16.gmra.mrb[160].mxu0 %v5105_v51  ;;  %4722 = vmatmul.mubr.bf16.gmra.mrb[160].mxu1 %v5106_v52  ;;  %v5114_v51 = vld [vmem:[%s5501_s4 + $0x4e8] ss:$12 sps:$4 sm:$0xff]  }
 0x1f2   : > { %2059 = vmatprep.mubr.bf16.mxu0 %v5107_v17  ;;  %4725 = vmatprep.mubr.bf16.mxu1 %v5109_v59 }
 0x1f4   : > { %v5821_v10 = vpop.f32.mrb[56].mxu0  ;;  %v5823_v18 = vpop.f32.mrb[56].mxu1 }
 0x1f5   : > { %6329 = vst [vmem:[#allocation27_spill] sm:$0xff] %v5823_v18  ;;  %v1847_v35 = vpop.f32.mrb[57].mxu0  ;;  %v2231_v36 = vpop.f32.mrb[57].mxu1  ;;  %v5115_v18 = vld [vmem:[%s5501_s4 + $0x3f0] ss:$12 sps:$4 sm:$0xff]  }
 0x1f6   : > { %v5827_v46 = vpop.f32.mrb[58].mxu0  ;;  %v5829_v24 = vpop.f32.mrb[58].mxu1 }
 0x1f7   : > { %6330 = vst [vmem:[#allocation28_spill] sm:$0xff] %v5829_v24  ;;  %v1850_v52 = vpop.f32.mrb[59].mxu0  ;;  %v2234_v17 = vpop.f32.mrb[59].mxu1 }
 0x1f9   : > { %2060 = vmatmul.mubr.bf16.gmra.mrb[164].mxu0 %v5110_v34  ;;  %4726 = vmatmul.mubr.bf16.gmra.mrb[164].mxu1 %v5111_v54  ;;  %v5845_v34 = vld [vmem:[#allocation7] ss:$0 sm:$0xff] }
 0x1fa   : > { %2067 = vmatprep.mubr.bf16.mxu0 %v5112_v60  ;;  %4729 = vmatprep.mubr.bf16.mxu1 %v5114_v51  ;;  %v1742_v60 = vadd.f32 %v5845_v34, %v5665_v19  ;;  %v1734_v51 = vadd.f32 %v5845_v34, %v5653_v7  ;;  %v5124_v7 = vld [vmem:[%s5501_s4 + $0x548] ss:$12 sps:$4 sm:$0xff]  }
 0x1fc   : > { %v5833_v59 = vpop.f32.mrb[60].mxu0  ;;  %v5835_v9 = vpop.f32.mrb[60].mxu1 }
 0x1fd   : > { %6331 = vst [vmem:[#allocation29_spill] sm:$0xff] %v5835_v9  ;;  %v1855_v35 = vpop.f32.mrb[61].mxu0  ;;  %v2239_v36 = vpop.f32.mrb[61].mxu1 }
 0x1fe   : > { %v5839_v6 = vpop.f32.mrb[62].mxu0  ;;  %v5841_v24 = vpop.f32.mrb[62].mxu1  ;;  %v1745_v36 = vadd.f32 %v5845_v34, %v5671_v25 }
 0x1ff   : > { %6332 = vst [vmem:[#allocation30_spill] sm:$0xff] %v5841_v24  ;;  %v1858_v52 = vpop.f32.mrb[63].mxu0  ;;  %v2242_v54 = vpop.f32.mrb[63].mxu1 }
 0x200   : > { %v5121_v54 = vld [vmem:[%s5501_s4 + $0x530] ss:$12 sps:$4 sm:$0xff]  }
 0x201   : > { %2068 = vmatmul.mubr.bf16.gmra.mrb[168].mxu0 %v5115_v18  ;;  %4730 = vmatmul.mubr.bf16.gmra.mrb[168].mxu1 %v5116_v42 }
 0x202   : > { %2075 = vmatprep.mubr.bf16.mxu0 %v5117_v2  ;;  %4733 = vmatprep.mubr.bf16.mxu1 %v5119_v28  ;;  %v5120_v2 = vld [vmem:[%s5501_s4 + $0x408] ss:$12 sps:$4 sm:$0xff]   ;;  %v1737_v28 = vadd.f32 %v5845_v34, %v5659_v13  ;;  %v1758_v13 = vadd.f32 %v5845_v34, %v5689_v43 }
 0x204   : > { %v5851_v17 = vpop.f32.mrb[64].mxu0  ;;  %v4627_v35 = vpop.f32.mrb[64].mxu1 }
 0x205   : > { %v2287_v52 = vadd.f32 %v4627_v35, %v1742_v60  ;;  %v1863_v18 = vpop.f32.mrb[65].mxu0  ;;  %v2278_v42 = vpop.f32.mrb[65].mxu1 }
 0x206   : > { %v2279_v24 = vadd.f32 %v2278_v42, %v1734_v51  ;;  %v5859_v19 = vpop.f32.mrb[66].mxu0  ;;  %v4628_v9 = vpop.f32.mrb[66].mxu1 }
 0x207   : > { %v2290_v16 = vadd.f32 %v4628_v9, %v1745_v36  ;;  %v1866_v30 = vpop.f32.mrb[67].mxu0  ;;  %v2281_v48 = vpop.f32.mrb[67].mxu1  ;;  %v2791_v25 = vmax.f32 %v2287_v52, 0.0  ;;  %v1750_v9 = vadd.f32 %v5845_v34, %v5677_v31  ;;  %v5125_v36 = vld [vmem:[%s5501_s4 + $0x420] ss:$12 sps:$4 sm:$0xff]   ;;  %v1753_v31 = vadd.f32 %v5845_v34, %v5683_v37 }
 0x208   : > { %v2282_v22 = vadd.f32 %v2281_v48, %v1737_v28  ;;  %v2789_v35 = vmax.f32 %v2279_v24, 0.0  ;;  %v1761_v24 = vadd.f32 %v5845_v34, %v5695_v49  ;;  %v5126_v52 = vld [vmem:[%s5501_s4 + $0x560] ss:$12 sps:$4 sm:$0xff]   ;;  %v5127_v28 = vld [vmem:[%s5501_s4 + $0x43c] ss:$12 sps:$4 sm:$0xff]  }
 0x209   : > { %v2792_v60 = vmax.f32 %v2290_v16, 0.0  ;;  %2076 = vmatmul.mubr.bf16.gmra.mrb[172].mxu0 %v5120_v2  ;;  %4734 = vmatmul.mubr.bf16.gmra.mrb[172].mxu1 %v5121_v54  ;;  %v5129_v49 = vld [vmem:[%s5501_s4 + $0x578] ss:$12 sps:$4 sm:$0xff]  }
 0x20a   : > { %v2790_v18 = vmax.f32 %v2282_v22, 0.0  ;;  %2083 = vmatprep.mubr.bf16.mxu0 %v5122_v58  ;;  %4737 = vmatprep.mubr.bf16.mxu1 %v5124_v7 }
 0x20b   : > { %v4162_v51 = vpack.c.bf16 %v2792_v60, %v2791_v25 }
 0x20c   : > { %v4157_v30 = vpack.c.bf16 %v2790_v18, %v2789_v35  ;;  %v5868_v48 = vpop.f32.mrb[68].mxu0  ;;  %v4631_v16 = vpop.f32.mrb[68].mxu1 }
 0x20d   : > { %4474 = vst [vmem:[%s5872_s20 + $0x8] sm:$0xff] %v4162_v51   ;;  %v2303_v22 = vadd.f32 %v4631_v16, %v1758_v13  ;;  %v1871_v43 = vpop.f32.mrb[69].mxu0  ;;  %v2294_v58 = vpop.f32.mrb[69].mxu1  ;;  %v1766_v16 = vadd.f32 %v5845_v34, %v5701_v55 }
 0x20e   : > { %4158 = vst [vmem:[%s5872_s20] sm:$0xff] %v4157_v30   ;;  %v2295_v42 = vadd.f32 %v2294_v58, %v1750_v9  ;;  %v5880_v2 = vpop.f32.mrb[70].mxu0  ;;  %v4632_v54 = vpop.f32.mrb[70].mxu1  ;;  %v1774_v9 = vadd.f32 %v5845_v34, %v5713_v3  ;;  %v1777_v58 = vadd.f32 %v5845_v34, %v5719_v11  ;;  %v1769_v3 = vadd.f32 %v5845_v34, %v5707_v61 }
 0x20f   : > { %v2306_v7 = vadd.f32 %v4632_v54, %v1761_v24  ;;  %v1874_v25 = vpop.f32.mrb[71].mxu0  ;;  %v2297_v60 = vpop.f32.mrb[71].mxu1  ;;  %v2795_v18 = vmax.f32 %v2303_v22, 0.0  ;;  %v5131_v54 = vld [vmem:[%s5501_s4 + $0x590] ss:$12 sps:$4 sm:$0xff]  }
 0x210   : > { %v2298_v35 = vadd.f32 %v2297_v60, %v1753_v31  ;;  %v2793_v51 = vmax.f32 %v2295_v42, 0.0  ;;  %v5130_v42 = vld [vmem:[%s5501_s4 + $0x438] ss:$12 sps:$4 sm:$0xff]   ;;  %v5134_v25 = vld [vmem:[%s5501_s4 + $0x5a8] ss:$12 sps:$4 sm:$0xff]  }
 0x211   : > { %v2796_v13 = vmax.f32 %v2306_v7, 0.0  ;;  %2084 = vmatmul.mubr.bf16.gmra.mrb[176].mxu0 %v5125_v36  ;;  %4738 = vmatmul.mubr.bf16.gmra.mrb[176].mxu1 %v5126_v52  ;;  %v5132_v7 = vld [vmem:[%s5501_s4 + $0x454] ss:$12 sps:$4 sm:$0xff]  }
 0x212   : > { %v2794_v37 = vmax.f32 %v2298_v35, 0.0  ;;  %2091 = vmatprep.mubr.bf16.mxu0 %v5127_v28  ;;  %4741 = vmatprep.mubr.bf16.mxu1 %v5129_v49 }
 0x213   : > { %v4172_v30 = vpack.c.bf16 %v2796_v13, %v2795_v18 }
 0x214   : > { %v4167_v24 = vpack.c.bf16 %v2794_v37, %v2793_v51  ;;  %v5888_v22 = vpop.f32.mrb[72].mxu0  ;;  %v4635_v43 = vpop.f32.mrb[72].mxu1 }
 0x215   : > { %4476 = vst [vmem:[%s5872_s20 + $0x18] sm:$0xff] %v4172_v30   ;;  %v2319_v36 = vadd.f32 %v4635_v43, %v1774_v9  ;;  %v1879_v52 = vpop.f32.mrb[73].mxu0  ;;  %v2310_v31 = vpop.f32.mrb[73].mxu1  ;;  %v1790_v9 = vadd.f32 %v5845_v34, %v5737_v39  ;;  %v1785_v39 = vadd.f32 %v5845_v34, %v5731_v29 }
 0x216   : > { %4475 = vst [vmem:[%s5872_s20 + $0x10] sm:$0xff] %v4167_v24   ;;  %v2311_v55 = vadd.f32 %v2310_v31, %v1766_v16  ;;  %v5898_v28 = vpop.f32.mrb[74].mxu0  ;;  %v4636_v49 = vpop.f32.mrb[74].mxu1  ;;  %v1782_v16 = vadd.f32 %v5845_v34, %v5725_v21 }
 0x217   : > { %v2322_v60 = vadd.f32 %v4636_v49, %v1777_v58  ;;  %v1882_v35 = vpop.f32.mrb[75].mxu0  ;;  %v2313_v18 = vpop.f32.mrb[75].mxu1  ;;  %v2799_v13 = vmax.f32 %v2319_v36, 0.0  ;;  %v1793_v36 = vadd.f32 %v5845_v34, %v5743_v47 }
 0x218   : > { %v2314_v11 = vadd.f32 %v2313_v18, %v1769_v3  ;;  %v2797_v37 = vmax.f32 %v2311_v55, 0.0  ;;  %v5136_v3 = vld [vmem:[%s5501_s4 + $0x5c0] ss:$12 sps:$4 sm:$0xff]  }
 0x219   : > { %v2800_v51 = vmax.f32 %v2322_v60, 0.0  ;;  %2092 = vmatmul.mubr.bf16.gmra.mrb[180].mxu0 %v5130_v42  ;;  %4742 = vmatmul.mubr.bf16.gmra.mrb[180].mxu1 %v5131_v54  ;;  %v5135_v54 = vld [vmem:[%s5501_s4 + $0x450] ss:$12 sps:$4 sm:$0xff]  }
 0x21a   : > { %v2798_v61 = vmax.f32 %v2314_v11, 0.0  ;;  %2099 = vmatprep.mubr.bf16.mxu0 %v5132_v7  ;;  %4745 = vmatprep.mubr.bf16.mxu1 %v5134_v25  ;;  %v5137_v7 = vld [vmem:[%s5501_s4 + $0x46c] ss:$12 sps:$4 sm:$0xff]  }
 0x21b   : > { %v4182_v30 = vpack.c.bf16 %v2800_v51, %v2799_v13  ;;  %v5139_v25 = vld [vmem:[%s5501_s4 + $0x5d8] ss:$12 sps:$4 sm:$0xff]  }
 0x21c   : > { %v4177_v24 = vpack.c.bf16 %v2798_v61, %v2797_v37  ;;  %v5906_v43 = vpop.f32.mrb[76].mxu0  ;;  %v4639_v58 = vpop.f32.mrb[76].mxu1  ;;  %v1806_v37 = vadd.f32 %v5845_v34, %v5761_v15  ;;  %v1801_v15 = vadd.f32 %v5845_v34, %v5755_v1  ;;  %v1822_v1 = vadd.f32 %v5845_v34, %v5785_v5 }
 0x21d   : > { %4478 = vst [vmem:[%s5872_s20 + $0x28] sm:$0xff] %v4182_v30   ;;  %v2335_v52 = vadd.f32 %v4639_v58, %v1790_v9  ;;  %v1887_v31 = vpop.f32.mrb[77].mxu0  ;;  %v2326_v42 = vpop.f32.mrb[77].mxu1  ;;  %v1798_v9 = vadd.f32 %v5845_v34, %v5749_v57  ;;  %v1809_v58 = vadd.f32 %v5845_v34, %v5767_v27 }
 0x21e   : > { %4477 = vst [vmem:[%s5872_s20 + $0x20] sm:$0xff] %v4177_v24   ;;  %v2327_v21 = vadd.f32 %v2326_v42, %v1782_v16  ;;  %v5916_v55 = vpop.f32.mrb[78].mxu0  ;;  %v4640_v49 = vpop.f32.mrb[78].mxu1  ;;  %v5140_v42 = vld [vmem:[%s5501_s4 + $0x468] ss:$12 sps:$4 sm:$0xff]  }
 0x21f   : > { %v2338_v60 = vadd.f32 %v4640_v49, %v1793_v36  ;;  %v1890_v35 = vpop.f32.mrb[79].mxu0  ;;  %v2329_v18 = vpop.f32.mrb[79].mxu1  ;;  %v2803_v11 = vmax.f32 %v2335_v52, 0.0 }
 0x220   : > { %v2330_v47 = vadd.f32 %v2329_v18, %v1785_v39  ;;  %v2801_v51 = vmax.f32 %v2327_v21, 0.0 }
 0x221   : > { %v2804_v13 = vmax.f32 %v2338_v60, 0.0  ;;  %2100 = vmatmul.mubr.bf16.gmra.mrb[184].mxu0 %v5135_v54  ;;  %4746 = vmatmul.mubr.bf16.gmra.mrb[184].mxu1 %v5136_v3  ;;  %v5141_v54 = vld [vmem:[%s5501_s4 + $0x5f0] ss:$12 sps:$4 sm:$0xff]  }
 0x222   : > { %v2802_v29 = vmax.f32 %v2330_v47, 0.0  ;;  %2107 = vmatprep.mubr.bf16.mxu0 %v5137_v7  ;;  %4749 = vmatprep.mubr.bf16.mxu1 %v5139_v25 }
 0x223   : > { %v4192_v61 = vpack.c.bf16 %v2804_v13, %v2803_v11  ;;  %v1814_v11 = vadd.f32 %v5845_v34, %v5773_v41 }
 0x224   : > { %v4187_v30 = vpack.c.bf16 %v2802_v29, %v2801_v51  ;;  %v5924_v16 = vpop.f32.mrb[80].mxu0  ;;  %v4643_v24 = vpop.f32.mrb[80].mxu1 }
 0x225   : > { %4480 = vst [vmem:[%s5872_s20 + $0x38] sm:$0xff] %v4192_v61   ;;  %v2351_v36 = vadd.f32 %v4643_v24, %v1806_v37  ;;  %v1895_v52 = vpop.f32.mrb[81].mxu0  ;;  %v2342_v31 = vpop.f32.mrb[81].mxu1  ;;  %v1825_v37 = vadd.f32 %v5845_v34, %v5791_v23  ;;  %v1817_v24 = vadd.f32 %v5845_v34, %v5779_v53  ;;  %v1830_v53 = vadd.f32 %v5845_v34, %v5797_v45 }
 0x226   : > { %4479 = vst [vmem:[%s5872_s20 + $0x30] sm:$0xff] %v4187_v30   ;;  %v2343_v3 = vadd.f32 %v2342_v31, %v1798_v9  ;;  %v5934_v39 = vpop.f32.mrb[82].mxu0  ;;  %v4644_v57 = vpop.f32.mrb[82].mxu1 }
 0x227   : > { %v2354_v21 = vadd.f32 %v4644_v57, %v1809_v58  ;;  %v1898_v49 = vpop.f32.mrb[83].mxu0  ;;  %v2345_v7 = vpop.f32.mrb[83].mxu1  ;;  %v2807_v27 = vmax.f32 %v2351_v36, 0.0  ;;  %v1838_v57 = vadd.f32 %v5845_v34, %v5809_v33 }
 0x228   : > { %v2346_v25 = vadd.f32 %v2345_v7, %v1801_v15  ;;  %v2805_v35 = vmax.f32 %v2343_v3, 0.0 }
 0x229   : > { %v2808_v60 = vmax.f32 %v2354_v21, 0.0  ;;  %2108 = vmatmul.mubr.bf16.gmra.mrb[188].mxu0 %v5140_v42  ;;  %4750 = vmatmul.mubr.bf16.gmra.mrb[188].mxu1 %v5141_v54 }
 0x22a   : > { %v2806_v18 = vmax.f32 %v2346_v25, 0.0 }
 0x22b   : > { %v4202_v47 = vpack.c.bf16 %v2808_v60, %v2807_v27  ;;  %v1841_v27 = vadd.f32 %v5845_v34, %v5815_v0 }
 0x22c   : > { %v4197_v13 = vpack.c.bf16 %v2806_v18, %v2805_v35  ;;  %v5940_v51 = vpop.f32.mrb[84].mxu0  ;;  %v4647_v29 = vpop.f32.mrb[84].mxu1 }
 0x22d   : > { %4482 = vst [vmem:[%s5872_s20 + $0x48] sm:$0xff] %v4202_v47   ;;  %v2367_v61 = vadd.f32 %v4647_v29, %v1822_v1  ;;  %v1903_v9 = vpop.f32.mrb[85].mxu0  ;;  %v2358_v30 = vpop.f32.mrb[85].mxu1  ;;  %v1833_v1 = vadd.f32 %v5845_v34, %v5803_v63  ;;  %v1846_v63 = vadd.f32 %v5845_v34, %v5821_v10 }
 0x22e   : > { %4481 = vst [vmem:[%s5872_s20 + $0x40] sm:$0xff] %v4197_v13   ;;  %v2359_v5 = vadd.f32 %v2358_v30, %v1814_v11  ;;  %v5948_v58 = vpop.f32.mrb[86].mxu0  ;;  %v4648_v36 = vpop.f32.mrb[86].mxu1 }
 0x22f   : > { %v2370_v41 = vadd.f32 %v4648_v36, %v1825_v37  ;;  %v1906_v52 = vpop.f32.mrb[87].mxu0  ;;  %v2361_v31 = vpop.f32.mrb[87].mxu1  ;;  %v2811_v54 = vmax.f32 %v2367_v61, 0.0 }
 0x230   : > { %v2362_v42 = vadd.f32 %v2361_v31, %v1817_v24  ;;  %v2809_v15 = vmax.f32 %v2359_v5, 0.0  ;;  %v1854_v24 = vadd.f32 %v5845_v34, %v5833_v59  ;;  %v1857_v31 = vadd.f32 %v5845_v34, %v5839_v6 }
 0x231   : > { %v2812_v23 = vmax.f32 %v2370_v41, 0.0 }
 0x232   : > { %v2810_v3 = vmax.f32 %v2362_v42, 0.0 }
 0x233   : > { %v4212_v21 = vpack.c.bf16 %v2812_v23, %v2811_v54 }
 0x234   : > { %v4207_v49 = vpack.c.bf16 %v2810_v3, %v2809_v15  ;;  %v5954_v7 = vpop.f32.mrb[88].mxu0  ;;  %v4651_v25 = vpop.f32.mrb[88].mxu1  ;;  %v1849_v15 = vadd.f32 %v5845_v34, %v5827_v46  ;;  %v1862_v46 = vadd.f32 %v5845_v34, %v5851_v17 }
 0x235   : > { %4484 = vst [vmem:[%s5872_s20 + $0x58] sm:$0xff] %v4212_v21   ;;  %v2383_v60 = vadd.f32 %v4651_v25, %v1838_v57  ;;  %v1911_v35 = vpop.f32.mrb[89].mxu0  ;;  %v2374_v18 = vpop.f32.mrb[89].mxu1 }
 0x236   : > { %4483 = vst [vmem:[%s5872_s20 + $0x50] sm:$0xff] %v4207_v49   ;;  %v2375_v33 = vadd.f32 %v2374_v18, %v1830_v53  ;;  %v5962_v47 = vpop.f32.mrb[90].mxu0  ;;  %v4652_v11 = vpop.f32.mrb[90].mxu1  ;;  %v1870_v35 = vadd.f32 %v5845_v34, %v5868_v48 }
 0x237   : > { %v2386_v45 = vadd.f32 %v4652_v11, %v1841_v27  ;;  %v1914_v13 = vpop.f32.mrb[91].mxu0  ;;  %v2377_v29 = vpop.f32.mrb[91].mxu1  ;;  %v2815_v61 = vmax.f32 %v2383_v60, 0.0 }
 0x238   : > { %v2378_v37 = vadd.f32 %v2377_v29, %v1833_v1  ;;  %v2813_v9 = vmax.f32 %v2375_v33, 0.0 }
 0x239   : > { %v2816_v0 = vmax.f32 %v2386_v45, 0.0  ;;  %v1873_v45 = vadd.f32 %v5845_v34, %v5880_v2 }
 0x23a   : > { %v2814_v30 = vmax.f32 %v2378_v37, 0.0 }
 0x23b   : > { %v4222_v5 = vpack.c.bf16 %v2816_v0, %v2815_v61  ;;  %v1865_v61 = vadd.f32 %v5845_v34, %v5859_v19  ;;  %v1878_v19 = vadd.f32 %v5845_v34, %v5888_v22 }
 0x23c   : > { %v4217_v36 = vpack.c.bf16 %v2814_v30, %v2813_v9  ;;  %v5968_v41 = vpop.f32.mrb[92].mxu0  ;;  %v4655_v52 = vpop.f32.mrb[92].mxu1 }
 0x23d   : > { %4486 = vst [vmem:[%s5872_s20 + $0x68] sm:$0xff] %v4222_v5   ;;  %v2399_v42 = vadd.f32 %v4655_v52, %v1854_v24  ;;  %v1919_v54 = vpop.f32.mrb[93].mxu0  ;;  %v2390_v23 = vpop.f32.mrb[93].mxu1 }
 0x23e   : > { %4485 = vst [vmem:[%s5872_s20 + $0x60] sm:$0xff] %v4217_v36   ;;  %v2391_v59 = vadd.f32 %v2390_v23, %v1846_v63  ;;  %v5976_v3 = vpop.f32.mrb[94].mxu0  ;;  %v4656_v57 = vpop.f32.mrb[94].mxu1 }
 0x23f   : > { %v2402_v10 = vadd.f32 %v4656_v57, %v1857_v31  ;;  %v1922_v21 = vpop.f32.mrb[95].mxu0  ;;  %v2393_v53 = vpop.f32.mrb[95].mxu1  ;;  %v2819_v25 = vmax.f32 %v2399_v42, 0.0  ;;  %v1886_v31 = vadd.f32 %v5845_v34, %v5906_v43 }
 0x240   : > { %v2394_v49 = vadd.f32 %v2393_v53, %v1849_v15  ;;  %v2817_v27 = vmax.f32 %v2391_v59, 0.0  ;;  %v1889_v59 = vadd.f32 %v5845_v34, %v5916_v55  ;;  %v1881_v53 = vadd.f32 %v5845_v34, %v5898_v28 }
 0x241   : > { %v2820_v6 = vmax.f32 %v2402_v10, 0.0  ;;  %v1894_v28 = vadd.f32 %v5845_v34, %v5924_v16 }
 0x242   : > { %v2818_v60 = vmax.f32 %v2394_v49, 0.0 }
 0x243   : > { %v4232_v18 = vpack.c.bf16 %v2820_v6, %v2819_v25 }
 0x244   : > { %v4227_v1 = vpack.c.bf16 %v2818_v60, %v2817_v27  ;;  %v5982_v33 = vpop.f32.mrb[96].mxu0  ;;  %v4659_v11 = vpop.f32.mrb[96].mxu1 }
 0x245   : > { %4488 = vst [vmem:[%s5872_s20 + $0x78] sm:$0xff] %v4232_v18   ;;  %v2415_v13 = vadd.f32 %v4659_v11, %v1870_v35  ;;  %v1927_v29 = vpop.f32.mrb[97].mxu0  ;;  %v2406_v37 = vpop.f32.mrb[97].mxu1 }
 0x246   : > { %4487 = vst [vmem:[%s5872_s20 + $0x70] sm:$0xff] %v4227_v1   ;;  %v2407_v48 = vadd.f32 %v2406_v37, %v1862_v46  ;;  %v5990_v0 = vpop.f32.mrb[98].mxu0  ;;  %v4660_v9 = vpop.f32.mrb[98].mxu1  ;;  %v1902_v1 = vadd.f32 %v5845_v34, %v5940_v51  ;;  %v1905_v37 = vadd.f32 %v5845_v34, %v5948_v58 }
 0x247   : > { %v2418_v17 = vadd.f32 %v4660_v9, %v1873_v45  ;;  %v1930_v30 = vpop.f32.mrb[99].mxu0  ;;  %v2409_v24 = vpop.f32.mrb[99].mxu1  ;;  %v2823_v63 = vmax.f32 %v2415_v13, 0.0 }
 0x248   : > { %v2410_v5 = vadd.f32 %v2409_v24, %v1865_v61  ;;  %v2821_v36 = vmax.f32 %v2407_v48, 0.0 }
 0x249   : > { %v2824_v2 = vmax.f32 %v2418_v17, 0.0  ;;  %v1897_v17 = vadd.f32 %v5845_v34, %v5934_v39  ;;  %v1910_v39 = vadd.f32 %v5845_v34, %v5954_v7 }
 0x24a   : > { %v2822_v52 = vmax.f32 %v2410_v5, 0.0 }
 0x24b   : > { %v4242_v42 = vpack.c.bf16 %v2824_v2, %v2823_v63 }
 0x24c   : > { %v4237_v54 = vpack.c.bf16 %v2822_v52, %v2821_v36  ;;  %v5996_v23 = vpop.f32.mrb[100].mxu0  ;;  %v4663_v15 = vpop.f32.mrb[100].mxu1 }
 0x24d   : > { %4490 = vst [vmem:[%s5872_s20 + $0x88] sm:$0xff] %v4242_v42   ;;  %v2431_v57 = vadd.f32 %v4663_v15, %v1886_v31  ;;  %v1935_v10 = vpop.f32.mrb[101].mxu0  ;;  %v2422_v21 = vpop.f32.mrb[101].mxu1  ;;  %v1918_v42 = vadd.f32 %v5845_v34, %v5968_v41 }
 0x24e   : > { %4489 = vst [vmem:[%s5872_s20 + $0x80] sm:$0xff] %v4237_v54   ;;  %v2423_v43 = vadd.f32 %v2422_v21, %v1878_v19  ;;  %v6004_v49 = vpop.f32.mrb[102].mxu0  ;;  %v4664_v25 = vpop.f32.mrb[102].mxu1 }
 0x24f   : > { %v2434_v22 = vadd.f32 %v4664_v25, %v1889_v59  ;;  %v1938_v6 = vpop.f32.mrb[103].mxu0  ;;  %v2425_v27 = vpop.f32.mrb[103].mxu1  ;;  %v2827_v35 = vmax.f32 %v2431_v57, 0.0  ;;  %v1921_v57 = vadd.f32 %v5845_v34, %v5976_v3 }
 0x250   : > { %v2426_v60 = vadd.f32 %v2425_v27, %v1881_v53  ;;  %v2825_v18 = vmax.f32 %v2423_v43, 0.0  ;;  %v1913_v43 = vadd.f32 %v5845_v34, %v5962_v47  ;;  %v1926_v47 = vadd.f32 %v5845_v34, %v5982_v33 }
 0x251   : > { %v2828_v55 = vmax.f32 %v2434_v22, 0.0 }
 0x252   : > { %v2826_v46 = vmax.f32 %v2426_v60, 0.0 }
 0x253   : > { %v4252_v11 = vpack.c.bf16 %v2828_v55, %v2827_v35 }
 0x254   : > { %v4247_v45 = vpack.c.bf16 %v2826_v46, %v2825_v18  ;;  %v6010_v13 = vpop.f32.mrb[104].mxu0  ;;  %v4667_v29 = vpop.f32.mrb[104].mxu1  ;;  %v1934_v46 = vadd.f32 %v5845_v34, %v5996_v23 }
 0x255   : > { %4492 = vst [vmem:[%s5872_s20 + $0x98] sm:$0xff] %v4252_v11   ;;  %v2447_v61 = vadd.f32 %v4667_v29, %v1902_v1  ;;  %v1943_v48 = vpop.f32.mrb[105].mxu0  ;;  %v2438_v9 = vpop.f32.mrb[105].mxu1  ;;  %v1937_v29 = vadd.f32 %v5845_v34, %v6004_v49 }
 0x256   : > { %4491 = vst [vmem:[%s5872_s20 + $0x90] sm:$0xff] %v4247_v45   ;;  %v2439_v51 = vadd.f32 %v2438_v9, %v1894_v28  ;;  %v6018_v30 = vpop.f32.mrb[106].mxu0  ;;  %v4668_v24 = vpop.f32.mrb[106].mxu1  ;;  %v1929_v9 = vadd.f32 %v5845_v34, %v5990_v0  ;;  %v1942_v0 = vadd.f32 %v5845_v34, %v6010_v13 }
 0x257   : > { %v2450_v16 = vadd.f32 %v4668_v24, %v1905_v37  ;;  %v1946_v5 = vpop.f32.mrb[107].mxu0  ;;  %v2441_v63 = vpop.f32.mrb[107].mxu1  ;;  %v2831_v36 = vmax.f32 %v2447_v61, 0.0 }
 0x258   : > { %v2442_v2 = vadd.f32 %v2441_v63, %v1897_v17  ;;  %v2829_v52 = vmax.f32 %v2439_v51, 0.0 }
 0x259   : > { %v2832_v58 = vmax.f32 %v2450_v16, 0.0 }
 0x25a   : > { %v2830_v31 = vmax.f32 %v2442_v2, 0.0 }
 0x25b   : > { %v4262_v19 = vpack.c.bf16 %v2832_v58, %v2831_v36 }
 0x25c   : > { %v4257_v54 = vpack.c.bf16 %v2830_v31, %v2829_v52  ;;  %v1949_v15 = vpop.f32.mrb[108].mxu0  ;;  %v4671_v59 = vpop.f32.mrb[108].mxu1 }
 0x25d   : > { %4494 = vst [vmem:[%s5872_s20 + $0xa8] sm:$0xff] %v4262_v19   ;;  %v2463_v10 = vadd.f32 %v4671_v59, %v1918_v42  ;;  %v1951_v21 = vpop.f32.mrb[109].mxu0  ;;  %v2454_v53 = vpop.f32.mrb[109].mxu1  ;;  %v1950_v58 = vadd.f32 %v5845_v34, %v1949_v15 }
 0x25e   : > { %4493 = vst [vmem:[%s5872_s20 + $0xa0] sm:$0xff] %v4257_v54   ;;  %v2455_v25 = vadd.f32 %v2454_v53, %v1910_v39  ;;  %v1952_v41 = vpop.f32.mrb[110].mxu0  ;;  %v4672_v22 = vpop.f32.mrb[110].mxu1 }
 0x25f   : > { %v2466_v6 = vadd.f32 %v4672_v22, %v1921_v57  ;;  %v1954_v7 = vpop.f32.mrb[111].mxu0  ;;  %v2457_v27 = vpop.f32.mrb[111].mxu1  ;;  %v2835_v35 = vmax.f32 %v2463_v10, 0.0  ;;  %v1953_v39 = vadd.f32 %v5845_v34, %v1952_v41  ;;  %v1945_v10 = vadd.f32 %v5845_v34, %v6018_v30 }
 0x260   : > { %v2458_v60 = vadd.f32 %v2457_v27, %v1913_v43  ;;  %v2833_v3 = vmax.f32 %v2455_v25, 0.0 }
 0x261   : > { %v2836_v55 = vmax.f32 %v2466_v6, 0.0 }
 0x262   : > { %v2834_v18 = vmax.f32 %v2458_v60, 0.0 }
 0x263   : > { %v4272_v1 = vpack.c.bf16 %v2836_v55, %v2835_v35 }
 0x264   : > { %v4267_v11 = vpack.c.bf16 %v2834_v18, %v2833_v3  ;;  %v1957_v28 = vpop.f32.mrb[112].mxu0  ;;  %v4675_v45 = vpop.f32.mrb[112].mxu1 }
 0x265   : > { %4496 = vst [vmem:[%s5872_s20 + $0xb8] sm:$0xff] %v4272_v1   ;;  %v2479_v37 = vadd.f32 %v4675_v45, %v1934_v46  ;;  %v1959_v61 = vpop.f32.mrb[113].mxu0  ;;  %v2470_v48 = vpop.f32.mrb[113].mxu1  ;;  %v1958_v55 = vadd.f32 %v5845_v34, %v1957_v28 }
 0x266   : > { %4495 = vst [vmem:[%s5872_s20 + $0xb0] sm:$0xff] %v4267_v11   ;;  %v2471_v17 = vadd.f32 %v2470_v48, %v1926_v47  ;;  %v1960_v23 = vpop.f32.mrb[114].mxu0  ;;  %v4676_v51 = vpop.f32.mrb[114].mxu1 }
 0x267   : > { %v2482_v24 = vadd.f32 %v4676_v51, %v1937_v29  ;;  %v1962_v33 = vpop.f32.mrb[115].mxu0  ;;  %v2473_v16 = vpop.f32.mrb[115].mxu1  ;;  %v2839_v63 = vmax.f32 %v2479_v37, 0.0  ;;  %v1961_v45 = vadd.f32 %v5845_v34, %v1960_v23 }
 0x268   : > { %v2474_v5 = vadd.f32 %v2473_v16, %v1929_v9  ;;  %v2837_v49 = vmax.f32 %v2471_v17, 0.0 }
 0x269   : > { %v2840_v2 = vmax.f32 %v2482_v24, 0.0 }
 0x26a   : > { %v2838_v36 = vmax.f32 %v2474_v5, 0.0 }
 0x26b   : > { %v4282_v52 = vpack.c.bf16 %v2840_v2, %v2839_v63 }
 0x26c   : > { %v4277_v31 = vpack.c.bf16 %v2838_v36, %v2837_v49  ;;  %v1965_v42 = vpop.f32.mrb[116].mxu0  ;;  %v4679_v19 = vpop.f32.mrb[116].mxu1 }
 0x26d   : > { %4498 = vst [vmem:[%s5872_s20 + $0xc8] sm:$0xff] %v4282_v52   ;;  %v2495_v54 = vadd.f32 %v4679_v19, %v1950_v58  ;;  %v1967_v59 = vpop.f32.mrb[117].mxu0  ;;  %v2486_v57 = vpop.f32.mrb[117].mxu1  ;;  %v1966_v60 = vadd.f32 %v5845_v34, %v1965_v42 }
 0x26e   : > { %4497 = vst [vmem:[%s5872_s20 + $0xc0] sm:$0xff] %v4277_v31   ;;  %v2487_v21 = vadd.f32 %v2486_v57, %v1942_v0  ;;  %v1968_v53 = vpop.f32.mrb[118].mxu0  ;;  %v4680_v15 = vpop.f32.mrb[118].mxu1 }
 0x26f   : > { %v2498_v43 = vadd.f32 %v4680_v15, %v1953_v39  ;;  %v1970_v25 = vpop.f32.mrb[119].mxu0  ;;  %v2489_v13 = vpop.f32.mrb[119].mxu1  ;;  %v2843_v6 = vmax.f32 %v2495_v54, 0.0  ;;  %v1969_v46 = vadd.f32 %v5845_v34, %v1968_v53 }
 0x270   : > { %v2490_v22 = vadd.f32 %v2489_v13, %v1945_v10  ;;  %v2841_v41 = vmax.f32 %v2487_v21, 0.0 }
 0x271   : > { %v2844_v7 = vmax.f32 %v2498_v43, 0.0 }
 0x272   : > { %v2842_v27 = vmax.f32 %v2490_v22, 0.0 }
 0x273   : > { %v4292_v35 = vpack.c.bf16 %v2844_v7, %v2843_v6 }
 0x274   : > { %v4287_v30 = vpack.c.bf16 %v2842_v27, %v2841_v41  ;;  %v1973_v3 = vpop.f32.mrb[120].mxu0  ;;  %v4683_v18 = vpop.f32.mrb[120].mxu1 }
 0x275   : > { %4500 = vst [vmem:[%s5872_s20 + $0xd8] sm:$0xff] %v4292_v35   ;;  %v2511_v1 = vadd.f32 %v4683_v18, %v1966_v60  ;;  %v1975_v47 = vpop.f32.mrb[121].mxu0  ;;  %v2502_v11 = vpop.f32.mrb[121].mxu1  ;;  %v1974_v63 = vadd.f32 %v5845_v34, %v1973_v3 }
 0x276   : > { %4499 = vst [vmem:[%s5872_s20 + $0xd0] sm:$0xff] %v4287_v30   ;;  %v2503_v29 = vadd.f32 %v2502_v11, %v1958_v55  ;;  %v1976_v37 = vpop.f32.mrb[122].mxu0  ;;  %v4684_v61 = vpop.f32.mrb[122].mxu1 }
 0x277   : > { %v2514_v48 = vadd.f32 %v4684_v61, %v1969_v46  ;;  %v1978_v9 = vpop.f32.mrb[123].mxu0  ;;  %v2505_v17 = vpop.f32.mrb[123].mxu1  ;;  %v2847_v51 = vmax.f32 %v2511_v1, 0.0  ;;  %v1977_v0 = vadd.f32 %v5845_v34, %v1976_v37 }
 0x278   : > { %v2506_v28 = vadd.f32 %v2505_v17, %v1961_v45  ;;  %v2845_v33 = vmax.f32 %v2503_v29, 0.0 }
 0x279   : > { %v2848_v24 = vmax.f32 %v2514_v48, 0.0 }
 0x27a   : > { %v2846_v16 = vmax.f32 %v2506_v28, 0.0 }
 0x27b   : > { %v4302_v5 = vpack.c.bf16 %v2848_v24, %v2847_v51 }
 0x27c   : > { %v4297_v2 = vpack.c.bf16 %v2846_v16, %v2845_v33  ;;  %v1981_v49 = vpop.f32.mrb[124].mxu0  ;;  %v4687_v23 = vpop.f32.mrb[124].mxu1 }
 0x27d   : > { %4502 = vst [vmem:[%s5872_s20 + $0xe8] sm:$0xff] %v4302_v5   ;;  %v1982_v36 = vadd.f32 %v5845_v34, %v1981_v49  ;;  %v1983_v58 = vpop.f32.mrb[125].mxu0  ;;  %v2518_v52 = vpop.f32.mrb[125].mxu1 }
 0x27e   : > { %4501 = vst [vmem:[%s5872_s20 + $0xe0] sm:$0xff] %v4297_v2   ;;  %v2519_v31 = vadd.f32 %v2518_v52, %v1974_v63  ;;  %v1984_v42 = vpop.f32.mrb[126].mxu0  ;;  %v4688_v19 = vpop.f32.mrb[126].mxu1 }
 0x27f   : > { %v2527_v39 = vadd.f32 %v4687_v23, %v1982_v36  ;;  %v1985_v54 = vadd.f32 %v5845_v34, %v1984_v42  ;;  %v1986_v59 = vpop.f32.mrb[127].mxu0  ;;  %v2521_v57 = vpop.f32.mrb[127].mxu1 }
 0x280   : > { %v2522_v10 = vadd.f32 %v2521_v57, %v1977_v0  ;;  %v2849_v53 = vmax.f32 %v2519_v31, 0.0 }
 0x281   : > { %v2530_v21 = vadd.f32 %v4688_v19, %v1985_v54  ;;  %v2851_v43 = vmax.f32 %v2527_v39, 0.0 }
 0x282   : > { %v2850_v15 = vmax.f32 %v2522_v10, 0.0 }
 0x283   : > { %v2852_v25 = vmax.f32 %v2530_v21, 0.0 }
 0x284   : > { %v4307_v13 = vpack.c.bf16 %v2850_v15, %v2849_v53  ;;  %v1989_v22 = vpop.f32.mrb[128].mxu0  ;;  %v4691_v6 = vpop.f32.mrb[128].mxu1 }
 0x285   : > { %v4312_v7 = vpack.c.bf16 %v2852_v25, %v2851_v43  ;;  %v1990_v41 = vadd.f32 %v5845_v34, %v1989_v22  ;;  %v1991_v27 = vpop.f32.mrb[129].mxu0  ;;  %v2534_v60 = vpop.f32.mrb[129].mxu1 }
 0x286   : > { %4503 = vst [vmem:[%s5872_s20 + $0xf0] sm:$0xff] %v4307_v13   ;;  %v1992_v35 = vpop.f32.mrb[130].mxu0  ;;  %v4692_v55 = vpop.f32.mrb[130].mxu1 }
 0x287   : > { %4504 = vst [vmem:[%s5872_s20 + $0xf8] sm:$0xff] %v4312_v7   ;;  %v2535_v30 = vadd.f32 %v2534_v60, %v1990_v41  ;;  %v1993_v3 = vadd.f32 %v5845_v34, %v1992_v35  ;;  %v1994_v18 = vpop.f32.mrb[131].mxu0  ;;  %v2537_v46 = vpop.f32.mrb[131].mxu1 }
 0x289   : > { %v2538_v1 = vadd.f32 %v2537_v46, %v1993_v3  ;;  %v2853_v47 = vmax.f32 %v2535_v30, 0.0 }
 0x28b   : > { %v2854_v11 = vmax.f32 %v2538_v1, 0.0 }
 0x28c   : > { %v1997_v45 = vpop.f32.mrb[132].mxu0  ;;  %v4695_v29 = vpop.f32.mrb[132].mxu1 }
 0x28d   : > { %v4317_v37 = vpack.c.bf16 %v2854_v11, %v2853_v47  ;;  %v1998_v61 = vadd.f32 %v5845_v34, %v1997_v45  ;;  %v1999_v48 = vpop.f32.mrb[133].mxu0  ;;  %v2550_v9 = vpop.f32.mrb[133].mxu1 }
 0x28e   : > { %v2000_v17 = vpop.f32.mrb[134].mxu0  ;;  %v4696_v28 = vpop.f32.mrb[134].mxu1 }
 0x28f   : > { %4505 = vst [vmem:[%s5872_s20 + $0x100] sm:$0xff] %v4317_v37   ;;  %v2543_v51 = vadd.f32 %v4691_v6, %v1998_v61  ;;  %v2001_v24 = vadd.f32 %v5845_v34, %v2000_v17  ;;  %v2002_v33 = vpop.f32.mrb[135].mxu0  ;;  %v2553_v16 = vpop.f32.mrb[135].mxu1 }
 0x291   : > { %v2546_v5 = vadd.f32 %v4692_v55, %v2001_v24  ;;  %v2855_v63 = vmax.f32 %v2543_v51, 0.0 }
 0x293   : > { %v2856_v2 = vmax.f32 %v2546_v5, 0.0 }
 0x294   : > { %v2005_v49 = vpop.f32.mrb[136].mxu0  ;;  %v4699_v23 = vpop.f32.mrb[136].mxu1 }
 0x295   : > { %v4322_v36 = vpack.c.bf16 %v2856_v2, %v2855_v63  ;;  %v2006_v58 = vadd.f32 %v5845_v34, %v2005_v49  ;;  %v2007_v52 = vpop.f32.mrb[137].mxu0  ;;  %v2566_v0 = vpop.f32.mrb[137].mxu1 }
 0x296   : > { %v2008_v31 = vpop.f32.mrb[138].mxu0  ;;  %v4700_v42 = vpop.f32.mrb[138].mxu1 }
 0x297   : > { %4506 = vst [vmem:[%s5872_s20 + $0x108] sm:$0xff] %v4322_v36   ;;  %v2551_v19 = vadd.f32 %v2550_v9, %v2006_v58  ;;  %v2009_v39 = vadd.f32 %v5845_v34, %v2008_v31  ;;  %v2010_v54 = vpop.f32.mrb[139].mxu0  ;;  %v2569_v59 = vpop.f32.mrb[139].mxu1 }
 0x299   : > { %v2554_v57 = vadd.f32 %v2553_v16, %v2009_v39  ;;  %v2857_v10 = vmax.f32 %v2551_v19, 0.0 }
 0x29b   : > { %v2858_v21 = vmax.f32 %v2554_v57, 0.0 }
 0x29c   : > { %v2013_v53 = vpop.f32.mrb[140].mxu0  ;;  %v6070_v15 = vpop.f32.mrb[140].mxu1 }
 0x29d   : > { %v4327_v43 = vpack.c.bf16 %v2858_v21, %v2857_v10  ;;  %v2014_v25 = vadd.f32 %v5845_v34, %v2013_v53  ;;  %v2015_v13 = vpop.f32.mrb[141].mxu0  ;;  %v2582_v22 = vpop.f32.mrb[141].mxu1 }
 0x29e   : > { %v2016_v6 = vpop.f32.mrb[142].mxu0  ;;  %v6073_v7 = vpop.f32.mrb[142].mxu1 }
 0x29f   : > { %4507 = vst [vmem:[%s5872_s20 + $0x110] sm:$0xff] %v4327_v43   ;;  %v2559_v41 = vadd.f32 %v4695_v29, %v2014_v25  ;;  %v2017_v27 = vadd.f32 %v5845_v34, %v2016_v6  ;;  %v2018_v60 = vpop.f32.mrb[143].mxu0  ;;  %v2585_v35 = vpop.f32.mrb[143].mxu1 }
 0x2a1   : > { %v2562_v55 = vadd.f32 %v4696_v28, %v2017_v27  ;;  %v2859_v30 = vmax.f32 %v2559_v41, 0.0 }
 0x2a3   : > { %v2860_v3 = vmax.f32 %v2562_v55, 0.0 }
 0x2a4   : > { %v2021_v18 = vpop.f32.mrb[144].mxu0  ;;  %v6077_v46 = vpop.f32.mrb[144].mxu1 }
 0x2a5   : > { %v4332_v1 = vpack.c.bf16 %v2860_v3, %v2859_v30  ;;  %v2022_v47 = vadd.f32 %v5845_v34, %v2021_v18  ;;  %v2023_v11 = vpop.f32.mrb[145].mxu0  ;;  %v6080_v45 = vpop.f32.mrb[145].mxu1 }
 0x2a6   : > { %v2024_v37 = vpop.f32.mrb[146].mxu0  ;;  %v6082_v61 = vpop.f32.mrb[146].mxu1 }
 0x2a7   : > { %4508 = vst [vmem:[%s5872_s20 + $0x118] sm:$0xff] %v4332_v1   ;;  %v2567_v29 = vadd.f32 %v2566_v0, %v2022_v47  ;;  %v2025_v48 = vadd.f32 %v5845_v34, %v2024_v37  ;;  %v2026_v9 = vpop.f32.mrb[147].mxu0  ;;  %v6086_v17 = vpop.f32.mrb[147].mxu1  ;;  %v6096_v0 = vld [vmem:[#allocation7] ss:$0 sm:$0xff] }
 0x2a9   : > { %v2570_v28 = vadd.f32 %v2569_v59, %v2025_v48  ;;  %v2861_v51 = vmax.f32 %v2567_v29, 0.0 }
 0x2ab   : > { %v2862_v24 = vmax.f32 %v2570_v28, 0.0 }
 0x2ac   : > { %v2029_v33 = vpop.f32.mrb[148].mxu0  ;;  %v6088_v16 = vpop.f32.mrb[148].mxu1 }
 0x2ad   : > { %v4337_v5 = vpack.c.bf16 %v2862_v24, %v2861_v51  ;;  %v2030_v63 = vadd.f32 %v5845_v34, %v2029_v33  ;;  %v2031_v2 = vpop.f32.mrb[149].mxu0  ;;  %v6091_v49 = vpop.f32.mrb[149].mxu1  ;;  %v2126_v24 = vadd.f32 %v6096_v0, %v5667_v20  ;;  %v2121_v20 = vadd.f32 %v6096_v0, %v5661_v14 }
 0x2ae   : > { %v2032_v36 = vpop.f32.mrb[150].mxu0  ;;  %v6093_v58 = vpop.f32.mrb[150].mxu1  ;;  %v2142_v14 = vadd.f32 %v6096_v0, %v5691_v44 }
 0x2af   : > { %4509 = vst [vmem:[%s5872_s20 + $0x120] sm:$0xff] %v4337_v5   ;;  %v2575_v52 = vadd.f32 %v4699_v23, %v2030_v63  ;;  %v2033_v31 = vadd.f32 %v6096_v0, %v2032_v36  ;;  %v2034_v19 = vpop.f32.mrb[151].mxu0  ;;  %v6099_v39 = vpop.f32.mrb[151].mxu1  ;;  %v2118_v63 = vadd.f32 %v6096_v0, %v5655_v8 }
 0x2b1   : > { %v2578_v54 = vadd.f32 %v4700_v42, %v2033_v31  ;;  %v2863_v59 = vmax.f32 %v2575_v52, 0.0 }
 0x2b3   : > { %v2864_v57 = vmax.f32 %v2578_v54, 0.0 }
 0x2b4   : > { %v2037_v34 = vpop.f32.mrb[152].mxu0  ;;  %v6101_v10 = vpop.f32.mrb[152].mxu1 }
 0x2b5   : > { %v4342_v21 = vpack.c.bf16 %v2864_v57, %v2863_v59  ;;  %v2038_v53 = vadd.f32 %v6096_v0, %v2037_v34  ;;  %v2039_v43 = vpop.f32.mrb[153].mxu0  ;;  %v6104_v25 = vpop.f32.mrb[153].mxu1 }
 0x2b6   : > { %v2040_v23 = vpop.f32.mrb[154].mxu0  ;;  %v6106_v13 = vpop.f32.mrb[154].mxu1 }
 0x2b7   : > { %4510 = vst [vmem:[%s5872_s20 + $0x128] sm:$0xff] %v4342_v21   ;;  %v2583_v6 = vadd.f32 %v2582_v22, %v2038_v53  ;;  %v2041_v41 = vadd.f32 %v6096_v0, %v2040_v23  ;;  %v2042_v42 = vpop.f32.mrb[155].mxu0  ;;  %v6110_v27 = vpop.f32.mrb[155].mxu1 }
 0x2b9   : > { %v2586_v60 = vadd.f32 %v2585_v35, %v2041_v41  ;;  %v2865_v55 = vmax.f32 %v2583_v6, 0.0 }
 0x2bb   : > { %v2866_v30 = vmax.f32 %v2586_v60, 0.0 }
 0x2bc   : > { %v2045_v3 = vpop.f32.mrb[156].mxu0  ;;  %v6112_v18 = vpop.f32.mrb[156].mxu1 }
 0x2bd   : > { %v4347_v1 = vpack.c.bf16 %v2866_v30, %v2865_v55  ;;  %v2046_v47 = vadd.f32 %v6096_v0, %v2045_v3  ;;  %v2047_v11 = vpop.f32.mrb[157].mxu0  ;;  %v6115_v37 = vpop.f32.mrb[157].mxu1 }
 0x2be   : > { %v2048_v29 = vpop.f32.mrb[158].mxu0  ;;  %v6117_v48 = vpop.f32.mrb[158].mxu1 }
 0x2bf   : > { %4511 = vst [vmem:[%s5872_s20 + $0x130] sm:$0xff] %v4347_v1   ;;  %v2591_v22 = vadd.f32 %v6070_v15, %v2046_v47  ;;  %v2049_v9 = vadd.f32 %v6096_v0, %v2048_v29  ;;  %v2050_v35 = vpop.f32.mrb[159].mxu0  ;;  %v6122_v28 = vpop.f32.mrb[159].mxu1  ;;  %v2129_v15 = vadd.f32 %v6096_v0, %v5673_v26  ;;  %v2134_v1 = vadd.f32 %v6096_v0, %v5679_v32 }
 0x2c1   : > { %v2594_v51 = vadd.f32 %v6073_v7, %v2049_v9  ;;  %v2867_v33 = vmax.f32 %v2591_v22, 0.0 }
 0x2c3   : > { %v2868_v5 = vmax.f32 %v2594_v51, 0.0 }
 0x2c4   : > { %v2053_v2 = vpop.f32.mrb[160].mxu0  ;;  %v4723_v36 = vpop.f32.mrb[160].mxu1 }
 0x2c5   : > { %v4352_v52 = vpack.c.bf16 %v2868_v5, %v2867_v33  ;;  %v2054_v31 = vadd.f32 %v6096_v0, %v2053_v2  ;;  %v2671_v19 = vadd.f32 %v4723_v36, %v2126_v24  ;;  %v2055_v54 = vpop.f32.mrb[161].mxu0  ;;  %v2662_v7 = vpop.f32.mrb[161].mxu1  ;;  %v2137_v24 = vadd.f32 %v6096_v0, %v5685_v38 }
 0x2c6   : > { %v2663_v59 = vadd.f32 %v2662_v7, %v2118_v63  ;;  %v2056_v57 = vpop.f32.mrb[162].mxu0  ;;  %v4724_v34 = vpop.f32.mrb[162].mxu1 }
 0x2c7   : > { %4512 = vst [vmem:[%s5872_s20 + $0x138] sm:$0xff] %v4352_v52   ;;  %v2599_v8 = vadd.f32 %v6080_v45, %v2054_v31  ;;  %v2057_v21 = vadd.f32 %v6096_v0, %v2056_v57  ;;  %v2674_v53 = vadd.f32 %v4724_v34, %v2129_v15  ;;  %v2058_v43 = vpop.f32.mrb[163].mxu0  ;;  %v2665_v26 = vpop.f32.mrb[163].mxu1  ;;  %v2887_v6 = vmax.f32 %v2671_v19, 0.0 }
 0x2c8   : > { %v2666_v23 = vadd.f32 %v2665_v26, %v2121_v20  ;;  %v2885_v60 = vmax.f32 %v2663_v59, 0.0  ;;  %v2158_v20 = vadd.f32 %v6096_v0, %v5715_v4  ;;  %v2150_v34 = vadd.f32 %v6096_v0, %v5703_v56 }
 0x2c9   : > { %v2602_v41 = vadd.f32 %v6086_v17, %v2057_v21  ;;  %v2888_v42 = vmax.f32 %v2674_v53, 0.0  ;;  %v2869_v30 = vmax.f32 %v2599_v8, 0.0  ;;  %v2145_v17 = vadd.f32 %v6096_v0, %v5697_v50 }
 0x2ca   : > { %v2886_v55 = vmax.f32 %v2666_v23, 0.0 }
 0x2cb   : > { %v2870_v3 = vmax.f32 %v2602_v41, 0.0  ;;  %v4402_v45 = vpack.c.bf16 %v2888_v42, %v2887_v6  ;;  %v2153_v41 = vadd.f32 %v6096_v0, %v5709_v62 }
 0x2cc   : > { %v4397_v47 = vpack.c.bf16 %v2886_v55, %v2885_v60  ;;  %v2061_v11 = vpop.f32.mrb[164].mxu0  ;;  %v4727_v29 = vpop.f32.mrb[164].mxu1 }
 0x2cd   : > { %v4357_v22 = vpack.c.bf16 %v2870_v3, %v2869_v30  ;;  %4522 = vst [vmem:[%s5872_s20 + $0x188] sm:$0xff] %v4402_v45   ;;  %v2062_v9 = vadd.f32 %v6096_v0, %v2061_v11  ;;  %v2687_v35 = vadd.f32 %v4727_v29, %v2142_v14  ;;  %v2063_v44 = vpop.f32.mrb[165].mxu0  ;;  %v2678_v51 = vpop.f32.mrb[165].mxu1 }
 0x2ce   : > { %4521 = vst [vmem:[%s5872_s20 + $0x180] sm:$0xff] %v4397_v47   ;;  %v2679_v33 = vadd.f32 %v2678_v51, %v2134_v1  ;;  %v2064_v32 = vpop.f32.mrb[166].mxu0  ;;  %v4728_v5 = vpop.f32.mrb[166].mxu1 }
 0x2cf   : > { %4513 = vst [vmem:[%s5872_s20 + $0x140] sm:$0xff] %v4357_v22   ;;  %v2607_v63 = vadd.f32 %v6077_v46, %v2062_v9  ;;  %v2065_v2 = vadd.f32 %v6096_v0, %v2064_v32  ;;  %v2690_v50 = vadd.f32 %v4728_v5, %v2145_v17  ;;  %v2066_v36 = vpop.f32.mrb[167].mxu0  ;;  %v2681_v15 = vpop.f32.mrb[167].mxu1  ;;  %v2891_v31 = vmax.f32 %v2687_v35, 0.0  ;;  %v6333_v35 = vld [vmem:[#allocation12_spill] sm:$0xff]  ;;  %v6334_v32 = vld [vmem:[#allocation14_spill] sm:$0xff] }
 0x2d0   : > { %v2682_v52 = vadd.f32 %v2681_v15, %v2137_v24  ;;  %v2889_v7 = vmax.f32 %v2679_v33, 0.0  ;;  %v2174_v17 = vadd.f32 %v6096_v0, %v5739_v40  ;;  %v2166_v44 = vadd.f32 %v6096_v0, %v6333_v35  ;;  %v6335_v36 = vld [vmem:[#allocation13_spill] sm:$0xff] }
 0x2d1   : > { %v2610_v19 = vadd.f32 %v6082_v61, %v2065_v2  ;;  %v2892_v54 = vmax.f32 %v2690_v50, 0.0  ;;  %v2871_v59 = vmax.f32 %v2607_v63, 0.0  ;;  %v2161_v61 = vadd.f32 %v6096_v0, %v5721_v12 }
 0x2d2   : > { %v2890_v38 = vmax.f32 %v2682_v52, 0.0  ;;  %v2169_v15 = vadd.f32 %v6096_v0, %v6335_v36 }
 0x2d3   : > { %v2872_v57 = vmax.f32 %v2610_v19, 0.0  ;;  %v4412_v46 = vpack.c.bf16 %v2892_v54, %v2891_v31 }
 0x2d4   : > { %v4407_v8 = vpack.c.bf16 %v2890_v38, %v2889_v7  ;;  %v2069_v21 = vpop.f32.mrb[168].mxu0  ;;  %v4731_v53 = vpop.f32.mrb[168].mxu1 }
 0x2d5   : > { %v4362_v43 = vpack.c.bf16 %v2872_v57, %v2871_v59  ;;  %4524 = vst [vmem:[%s5872_s20 + $0x198] sm:$0xff] %v4412_v46   ;;  %v2070_v26 = vadd.f32 %v6096_v0, %v2069_v21  ;;  %v2703_v23 = vadd.f32 %v4731_v53, %v2158_v20  ;;  %v2071_v4 = vpop.f32.mrb[169].mxu0  ;;  %v2694_v6 = vpop.f32.mrb[169].mxu1 }
 0x2d6   : > { %4523 = vst [vmem:[%s5872_s20 + $0x190] sm:$0xff] %v4407_v8   ;;  %v2695_v42 = vadd.f32 %v2694_v6, %v2150_v34  ;;  %v2072_v56 = vpop.f32.mrb[170].mxu0  ;;  %v4732_v60 = vpop.f32.mrb[170].mxu1  ;;  %v6337_v4 = vld [vmem:[#allocation15_spill] sm:$0xff] }
 0x2d7   : > { %4514 = vst [vmem:[%s5872_s20 + $0x148] sm:$0xff] %v4362_v43   ;;  %v2615_v55 = vadd.f32 %v6091_v49, %v2070_v26  ;;  %v2073_v14 = vadd.f32 %v6096_v0, %v2072_v56  ;;  %v2706_v12 = vadd.f32 %v4732_v60, %v2161_v61  ;;  %v2074_v30 = vpop.f32.mrb[171].mxu0  ;;  %v2697_v3 = vpop.f32.mrb[171].mxu1  ;;  %v2895_v1 = vmax.f32 %v2703_v23, 0.0  ;;  %v6336_v61 = vld [vmem:[#allocation17_spill] sm:$0xff]  ;;  %v6338_v60 = vld [vmem:[#allocation18_spill] sm:$0xff] }
 0x2d8   : > { %v2698_v45 = vadd.f32 %v2697_v3, %v2153_v41  ;;  %v2893_v29 = vmax.f32 %v2695_v42, 0.0  ;;  %v2190_v43 = vadd.f32 %v6096_v0, %v6336_v61  ;;  %v2182_v6 = vadd.f32 %v6096_v0, %v6337_v4 }
 0x2d9   : > { %v2618_v47 = vadd.f32 %v6099_v39, %v2073_v14  ;;  %v2896_v11 = vmax.f32 %v2706_v12, 0.0  ;;  %v2873_v22 = vmax.f32 %v2615_v55, 0.0  ;;  %v2177_v39 = vadd.f32 %v6096_v0, %v6334_v32 }
 0x2da   : > { %v2894_v62 = vmax.f32 %v2698_v45, 0.0  ;;  %v6339_v45 = vld [vmem:[#allocation16_spill] sm:$0xff] }
 0x2db   : > { %v2874_v9 = vmax.f32 %v2618_v47, 0.0  ;;  %v4422_v49 = vpack.c.bf16 %v2896_v11, %v2895_v1  ;;  %v2185_v1 = vadd.f32 %v6096_v0, %v6339_v45 }
 0x2dc   : > { %v4417_v51 = vpack.c.bf16 %v2894_v62, %v2893_v29  ;;  %v2077_v24 = vpop.f32.mrb[172].mxu0  ;;  %v4735_v33 = vpop.f32.mrb[172].mxu1 }
 0x2dd   : > { %v4367_v5 = vpack.c.bf16 %v2874_v9, %v2873_v22  ;;  %4526 = vst [vmem:[%s5872_s20 + $0x1a8] sm:$0xff] %v4422_v49   ;;  %v2078_v63 = vadd.f32 %v6096_v0, %v2077_v24  ;;  %v2719_v2 = vadd.f32 %v4735_v33, %v2174_v17  ;;  %v2079_v40 = vpop.f32.mrb[173].mxu0  ;;  %v2710_v50 = vpop.f32.mrb[173].mxu1 }
 0x2de   : > { %4525 = vst [vmem:[%s5872_s20 + $0x1a0] sm:$0xff] %v4417_v51   ;;  %v2711_v52 = vadd.f32 %v2710_v50, %v2166_v44  ;;  %v2080_v31 = vpop.f32.mrb[174].mxu0  ;;  %v4736_v19 = vpop.f32.mrb[174].mxu1  ;;  %v6341_v40 = vld [vmem:[#allocation19_spill] sm:$0xff] }
 0x2df   : > { %4515 = vst [vmem:[%s5872_s20 + $0x150] sm:$0xff] %v4367_v5   ;;  %v2623_v54 = vadd.f32 %v6088_v16, %v2078_v63  ;;  %v2081_v7 = vadd.f32 %v6096_v0, %v2080_v31  ;;  %v2722_v38 = vadd.f32 %v4736_v19, %v2177_v39  ;;  %v2082_v20 = vpop.f32.mrb[175].mxu0  ;;  %v2713_v59 = vpop.f32.mrb[175].mxu1  ;;  %v2899_v46 = vmax.f32 %v2719_v2, 0.0  ;;  %v6340_v39 = vld [vmem:[#allocation21_spill] sm:$0xff]  ;;  %v6342_v31 = vld [vmem:[#allocation22_spill] sm:$0xff] }
 0x2e0   : > { %v2714_v57 = vadd.f32 %v2713_v59, %v2169_v15  ;;  %v2897_v21 = vmax.f32 %v2711_v52, 0.0  ;;  %v2206_v5 = vadd.f32 %v6096_v0, %v6340_v39  ;;  %v2198_v50 = vadd.f32 %v6096_v0, %v6341_v40  ;;  %v6343_v59 = vld [vmem:[#allocation20_spill] sm:$0xff] }
 0x2e1   : > { %v2626_v34 = vadd.f32 %v6093_v58, %v2081_v7  ;;  %v2900_v8 = vmax.f32 %v2722_v38, 0.0  ;;  %v2875_v26 = vmax.f32 %v2623_v54, 0.0  ;;  %v2193_v58 = vadd.f32 %v6096_v0, %v6338_v60 }
 0x2e2   : > { %v2898_v53 = vmax.f32 %v2714_v57, 0.0  ;;  %v2201_v57 = vadd.f32 %v6096_v0, %v6343_v59 }
 0x2e3   : > { %v2876_v23 = vmax.f32 %v2626_v34, 0.0  ;;  %v4432_v16 = vpack.c.bf16 %v2900_v8, %v2899_v46 }
 0x2e4   : > { %v4427_v41 = vpack.c.bf16 %v2898_v53, %v2897_v21  ;;  %v2085_v42 = vpop.f32.mrb[176].mxu0  ;;  %v4739_v56 = vpop.f32.mrb[176].mxu1 }
 0x2e5   : > { %v4372_v55 = vpack.c.bf16 %v2876_v23, %v2875_v26  ;;  %4528 = vst [vmem:[%s5872_s20 + $0x1b8] sm:$0xff] %v4432_v16   ;;  %v2086_v14 = vadd.f32 %v6096_v0, %v2085_v42  ;;  %v2735_v12 = vadd.f32 %v4739_v56, %v2190_v43  ;;  %v2087_v30 = vpop.f32.mrb[177].mxu0  ;;  %v2726_v3 = vpop.f32.mrb[177].mxu1  ;;  %v6344_v56 = vld [vmem:[#allocation25_spill] sm:$0xff] }
 0x2e6   : > { %4527 = vst [vmem:[%s5872_s20 + $0x1b0] sm:$0xff] %v4427_v41   ;;  %v2727_v47 = vadd.f32 %v2726_v3, %v2182_v6  ;;  %v2088_v11 = vpop.f32.mrb[178].mxu0  ;;  %v4740_v29 = vpop.f32.mrb[178].mxu1  ;;  %v2222_v60 = vadd.f32 %v6096_v0, %v6344_v56 }
 0x2e7   : > { %4516 = vst [vmem:[%s5872_s20 + $0x158] sm:$0xff] %v4372_v55   ;;  %v2631_v62 = vadd.f32 %v6104_v25, %v2086_v14  ;;  %v2089_v17 = vadd.f32 %v6096_v0, %v2088_v11  ;;  %v2738_v22 = vadd.f32 %v4740_v29, %v2193_v58  ;;  %v2090_v9 = vpop.f32.mrb[179].mxu0  ;;  %v2729_v49 = vpop.f32.mrb[179].mxu1  ;;  %v2903_v44 = vmax.f32 %v2735_v12, 0.0  ;;  %v6345_v14 = vld [vmem:[#allocation23_spill] sm:$0xff] }
 0x2e8   : > { %v2730_v35 = vadd.f32 %v2729_v49, %v2185_v1  ;;  %v2901_v33 = vmax.f32 %v2727_v47, 0.0  ;;  %v2214_v12 = vadd.f32 %v6096_v0, %v6345_v14  ;;  %v6346_v1 = vld [vmem:[#allocation26_spill] sm:$0xff] }
 0x2e9   : > { %v2634_v51 = vadd.f32 %v6110_v27, %v2089_v17  ;;  %v2904_v24 = vmax.f32 %v2738_v22, 0.0  ;;  %v2877_v63 = vmax.f32 %v2631_v62, 0.0  ;;  %v2209_v27 = vadd.f32 %v6096_v0, %v6342_v31  ;;  %v6347_v22 = vld [vmem:[#allocation24_spill] sm:$0xff] }
 0x2ea   : > { %v2902_v32 = vmax.f32 %v2730_v35, 0.0  ;;  %v2217_v9 = vadd.f32 %v6096_v0, %v6347_v22 }
 0x2eb   : > { %v2878_v2 = vmax.f32 %v2634_v51, 0.0  ;;  %v4442_v25 = vpack.c.bf16 %v2904_v24, %v2903_v44 }
 0x2ec   : > { %v4437_v36 = vpack.c.bf16 %v2902_v32, %v2901_v33  ;;  %v2093_v15 = vpop.f32.mrb[180].mxu0  ;;  %v4743_v52 = vpop.f32.mrb[180].mxu1 }
 0x2ed   : > { %v4377_v19 = vpack.c.bf16 %v2878_v2, %v2877_v63  ;;  %4530 = vst [vmem:[%s5872_s20 + $0x1c8] sm:$0xff] %v4442_v25   ;;  %v2094_v54 = vadd.f32 %v6096_v0, %v2093_v15  ;;  %v2751_v7 = vadd.f32 %v4743_v52, %v2206_v5  ;;  %v2095_v38 = vpop.f32.mrb[181].mxu0  ;;  %v2742_v20 = vpop.f32.mrb[181].mxu1 }
 0x2ee   : > { %4529 = vst [vmem:[%s5872_s20 + $0x1c0] sm:$0xff] %v4437_v36   ;;  %v2743_v46 = vadd.f32 %v2742_v20, %v2198_v50  ;;  %v2096_v34 = vpop.f32.mrb[182].mxu0  ;;  %v4744_v8 = vpop.f32.mrb[182].mxu1  ;;  %v6348_v36 = vld [vmem:[#allocation29_spill] sm:$0xff]  ;;  %v6350_v20 = vld [vmem:[#allocation30_spill] sm:$0xff] }
 0x2ef   : > { %4517 = vst [vmem:[%s5872_s20 + $0x160] sm:$0xff] %v4377_v19   ;;  %v2639_v21 = vadd.f32 %v6101_v10, %v2094_v54  ;;  %v2097_v53 = vadd.f32 %v6096_v0, %v2096_v34  ;;  %v2754_v61 = vadd.f32 %v4744_v8, %v2209_v27  ;;  %v2098_v43 = vpop.f32.mrb[183].mxu0  ;;  %v2745_v26 = vpop.f32.mrb[183].mxu1  ;;  %v2907_v16 = vmax.f32 %v2751_v7, 0.0  ;;  %v6349_v27 = vld [vmem:[#allocation27_spill] sm:$0xff] }
 0x2f0   : > { %v2746_v23 = vadd.f32 %v2745_v26, %v2201_v57  ;;  %v2905_v41 = vmax.f32 %v2743_v46, 0.0  ;;  %v2238_v15 = vadd.f32 %v6096_v0, %v6348_v36  ;;  %v2230_v19 = vadd.f32 %v6096_v0, %v6349_v27 }
 0x2f1   : > { %v2642_v4 = vadd.f32 %v6106_v13, %v2097_v53  ;;  %v2908_v6 = vmax.f32 %v2754_v61, 0.0  ;;  %v2879_v58 = vmax.f32 %v2639_v21, 0.0  ;;  %v2225_v13 = vadd.f32 %v6096_v0, %v6346_v1  ;;  %v6351_v21 = vld [vmem:[#allocation28_spill] sm:$0xff] }
 0x2f2   : > { %v2906_v42 = vmax.f32 %v2746_v23, 0.0  ;;  %v2233_v53 = vadd.f32 %v6096_v0, %v6351_v21 }
 0x2f3   : > { %v2880_v55 = vmax.f32 %v2642_v4, 0.0  ;;  %v4452_v10 = vpack.c.bf16 %v2908_v6, %v2907_v16 }
 0x2f4   : > { %v4447_v30 = vpack.c.bf16 %v2906_v42, %v2905_v41  ;;  %v2101_v3 = vpop.f32.mrb[184].mxu0  ;;  %v4747_v45 = vpop.f32.mrb[184].mxu1 }
 0x2f5   : > { %v4382_v47 = vpack.c.bf16 %v2880_v55, %v2879_v58  ;;  %4532 = vst [vmem:[%s5872_s20 + $0x1d8] sm:$0xff] %v4452_v10   ;;  %v2102_v11 = vadd.f32 %v6096_v0, %v2101_v3  ;;  %v2767_v29 = vadd.f32 %v4747_v45, %v2222_v60  ;;  %v2103_v62 = vpop.f32.mrb[185].mxu0  ;;  %v2758_v17 = vpop.f32.mrb[185].mxu1 }
 0x2f6   : > { %4531 = vst [vmem:[%s5872_s20 + $0x1d0] sm:$0xff] %v4447_v30   ;;  %v2759_v49 = vadd.f32 %v2758_v17, %v2214_v12  ;;  %v2104_v35 = vpop.f32.mrb[186].mxu0  ;;  %v4748_v44 = vpop.f32.mrb[186].mxu1 }
 0x2f7   : > { %4518 = vst [vmem:[%s5872_s20 + $0x168] sm:$0xff] %v4382_v47   ;;  %v2647_v51 = vadd.f32 %v6115_v37, %v2102_v11  ;;  %v2105_v24 = vadd.f32 %v6096_v0, %v2104_v35  ;;  %v2770_v33 = vadd.f32 %v4748_v44, %v2225_v13  ;;  %v2106_v32 = vpop.f32.mrb[187].mxu0  ;;  %v2761_v39 = vpop.f32.mrb[187].mxu1  ;;  %v2911_v63 = vmax.f32 %v2767_v29, 0.0 }
 0x2f8   : > { %v2762_v5 = vadd.f32 %v2761_v39, %v2217_v9  ;;  %v2909_v40 = vmax.f32 %v2759_v49, 0.0 }
 0x2f9   : > { %v2650_v2 = vadd.f32 %v6122_v28, %v2105_v24  ;;  %v2912_v25 = vmax.f32 %v2770_v33, 0.0  ;;  %v2881_v52 = vmax.f32 %v2647_v51, 0.0  ;;  %v2241_v28 = vadd.f32 %v6096_v0, %v6350_v20 }
 0x2fa   : > { %v2910_v50 = vmax.f32 %v2762_v5, 0.0 }
 0x2fb   : > { %v2882_v31 = vmax.f32 %v2650_v2, 0.0  ;;  %v4462_v37 = vpack.c.bf16 %v2912_v25, %v2911_v63 }
 0x2fc   : > { %v4457_v54 = vpack.c.bf16 %v2910_v50, %v2909_v40  ;;  %v2109_v7 = vpop.f32.mrb[188].mxu0  ;;  %v4751_v38 = vpop.f32.mrb[188].mxu1 }
 0x2fd   : > { %v4387_v59 = vpack.c.bf16 %v2882_v31, %v2881_v52  ;;  %4534 = vst [vmem:[%s5872_s20 + $0x1e8] sm:$0xff] %v4462_v37   ;;  %v2110_v57 = vadd.f32 %v6096_v0, %v2109_v7  ;;  %v2783_v46 = vadd.f32 %v4751_v38, %v2238_v15  ;;  %v2111_v34 = vpop.f32.mrb[189].mxu0  ;;  %v2774_v8 = vpop.f32.mrb[189].mxu1 }
 0x2fe   : > { %4533 = vst [vmem:[%s5872_s20 + $0x1e0] sm:$0xff] %v4457_v54   ;;  %v2775_v61 = vadd.f32 %v2774_v8, %v2230_v19  ;;  %v2112_v43 = vpop.f32.mrb[190].mxu0  ;;  %v4752_v26 = vpop.f32.mrb[190].mxu1 }
 0x2ff   : > { %4519 = vst [vmem:[%s5872_s20 + $0x170] sm:$0xff] %v4387_v59   ;;  %v2655_v23 = vadd.f32 %v6112_v18, %v2110_v57  ;;  %v2113_v16 = vadd.f32 %v6096_v0, %v2112_v43  ;;  %v2786_v4 = vadd.f32 %v4752_v26, %v2241_v28  ;;  %v2114_v6 = vpop.f32.mrb[191].mxu0  ;;  %v2777_v41 = vpop.f32.mrb[191].mxu1  ;;  %v2915_v56 = vmax.f32 %v2783_v46, 0.0 }
 0x300   : > { %v2778_v42 = vadd.f32 %v2777_v41, %v2233_v53  ;;  %v2913_v55 = vmax.f32 %v2775_v61, 0.0 }
 0x301   : > { %v2658_v60 = vadd.f32 %v6117_v48, %v2113_v16  ;;  %v2916_v58 = vmax.f32 %v2786_v4, 0.0  ;;  %v2883_v18 = vmax.f32 %v2655_v23, 0.0 }
 0x302   : > { %v2914_v10 = vmax.f32 %v2778_v42, 0.0 }
 0x303   : > { %v2884_v14 = vmax.f32 %v2658_v60, 0.0  ;;  %v4472_v0 = vpack.c.bf16 %v2916_v58, %v2915_v56 }
 0x304   : > { %v4467_v12 = vpack.c.bf16 %v2914_v10, %v2913_v55 }
 0x305   : > { %v4392_v48 = vpack.c.bf16 %v2884_v14, %v2883_v18  ;;  %4536 = vst [vmem:[%s5872_s20 + $0x1f8] sm:$0xff] %v4472_v0  }
 0x306   : > { %4535 = vst [vmem:[%s5872_s20 + $0x1f0] sm:$0xff] %v4467_v12  }
 0x307   : > { %4520 = vst [vmem:[%s5872_s20 + $0x178] sm:$0xff] %v4392_v48  }
 0x308   : > { %5242 = shalt.err (!%p5239_p7)
}
 0x309   : > { %s5243_s17 = scalar_lea.hbm %s6248_s23, 8192  ;;  %s5247_s29 = scalar_lea.hbm %s6299_s3, 73728 }
 0x30a   : > { %p5244_p9 = scmp.ne.s32.totalorder %s6248_s23, %s5243_s17  ;;  %p5248_p5 = scmp.lt.u32.totalorder %s6248_s23, %s6299_s3 }
 0x30b   : > { %p5249_p10 = scmp.lt.u32.totalorder %s5247_s29, %s5243_s17  ;;  %p5251_p1 = scmp.lt.u32.totalorder %s5243_s17, %s6248_s23 }
 0x30c   : > { %p5245_p12 = pnand %p5244_p9, %p5445_p4 }
 0x30d   : > { %p5250_p11 = por %p5249_p10, %p5248_p5 }
 0x30e   : > { %p5246_p0 = pneg %p5245_p12 }
 0x30f   : > { %p5252_p2 = por %p5251_p1, %p5250_p11 }
 0x311   : > { %p5253_p6 = pnand %p5252_p2, %p5246_p0 }
 0x313   : > { %5256 = shalt.err (!%p5253_p6)
}
 0x314   : > { %s5310_s18 = smov 64   ;;  %s5311_s20 = smov 4  }
 0x315   : > { %4798 = dma.vmem_to_hbm [thread:$0]  (%p5445_p4), %s6250_s24, 8192, %s6248_s23, %s3558_s16, %s5310_s18, %s5310_s18, %s5311_s20  }
 0x316 PF: > { %p4820_p8 = scmp.ge.s32.totalorder %s5299_s15, 2  ;;  %s3586_s11 = sand.u32 1, %s5287_s12  }
 0x317   : > { %p6352_p13 = scmp.ne.s32.totalorder %s6304_s19, 0  ;;  %s3587_s27 = scalar_lea.sflag [#allocation4], %s3586_s11 }
 0x319   : > { %p4812_p3 = pnand %p4820_p8, %p6352_p13 }
 0x31b   : > { %5282 = dma.done.wait (!%p4812_p3), %s3587_s27, 8192  }
 0x31c   : > { %5284 = vsyncadd (!%p4812_p3), %s3587_s27, 4294959104  ;;  %p17_p7 = scmp.ge.s32.totalorder %s5435_s5, 11   ;;  %s6353_s12 = smov %s5291_s13 }
 0x31d   : > { %s6354_s13 = smov %s5295_s14  ;;  %s6355_s14 = smov %s5451_s8 }
 0x31e   : > { %s6356_s15 = smov %s5435_s5  ;;  %19 = sbr.rel (!%p17_p7) target bundleno = 6 (0x6), region = 85 }
 0x325   :  { %3592 = vsyncpa [#allocation3], 1 }
 0x326   :  { %3594 = vsyncpa [#allocation3 + $0x1], 1 }
 0x327   :  { %3595 = vsyncpa [#allocation6], 1 }
 0x328   :  { %3596 = vsyncpa [#allocation4], 1 }
 0x329   :  { %3598 = vsyncpa [#allocation4 + $0x1], 1 }

</bundles_post_ra>
